<compile_context>
chip_gen: v7x
topology: tpu7x:2x2x1
jax: 0.10.0
libtpu: 0.0.40
codegen_flags: <defaults>
</compile_context>

<pallas_src>
import functools

import jax
import jax.numpy as jnp
from jax.experimental import pallas as pl
from jax.experimental.pallas import tpu as pltpu

_PAD_QUERY_KEY = -2   # sentinel for padded query slots
_PAD_VOCAB_KEY = -1   # sentinel for padded vocab slots (real hashes are >= 0)


def _token_hash(token: str) -> int:
    """Deterministic polynomial string hash -> non-negative int32 key."""
    h = 7
    for ch in token:
        h = (h * 131 + ord(ch)) % 2147483647
    return h


def _round_up(x: int, m: int) -> int:
    return ((x + m - 1) // m) * m


def _lookup_kernel(q_ref, keys_ref, o_ref, acc_ref, *, v_chunk):
    # q_ref:    (t_tile, 1)  int32  query keys (sublane column, constant over vocab steps)
    # keys_ref: (1, v_tile)  int32  vocab keys for this step (lane-dense)
    # o_ref:    (t_tile, 1)  int32  matched positions (written on last vocab step)
    # acc_ref:  (t_tile, 1)  int32  resident accumulator across vocab steps
    j = pl.program_id(1)
    t_tile = q_ref.shape[0]
    v_tile = keys_ref.shape[1]
    n_chunks = v_tile // v_chunk

    @pl.when(j == 0)
    def _init():
        acc_ref[...] = jnp.full((t_tile, 1), -1, dtype=jnp.int32)

    q = q_ref[...]                     # (t_tile, 1), broadcast over lanes at compare time
    base = j * v_tile                  # global offset of this vocab tile
    # Hoisted, loop-invariant chunk-local lane positions (JAX does not CSE broadcasts).
    lane_pos = jax.lax.broadcasted_iota(jnp.int32, (t_tile, v_chunk), 1)

    def chunk_body(c, best):
        off = pl.multiple_of(c * v_chunk, v_chunk)
        kc = keys_ref[:, pl.ds(off, v_chunk)]               # (1, v_chunk) lane-dense
        match = q == kc                                      # (t_tile, v_chunk) VPU compare
        # per-chunk reduce over the vocab (lane) axis -> (t_tile, 1)
        loc = jnp.max(jnp.where(match, lane_pos, jnp.int32(-1)), axis=1, keepdims=True)
        # keys are unique -> select-overwrite; global offset applied AFTER the reduce
        return jnp.where(loc >= 0, loc + (base + off), best)

    acc_ref[...] = jax.lax.fori_loop(0, n_chunks, chunk_body, acc_ref[...], unroll=True)

    @pl.when(j == pl.num_programs(1) - 1)
    def _finalize():
        o_ref[...] = acc_ref[...]


def pallas_lookup_positions(query_keys, vocab_keys, *, t_tile=512, v_tile=2048,
                            v_chunk=256):
    """query_keys: (T,) int32; vocab_keys: (V,) int32 -> (T,) int32 positions.

    For each query key, returns the position of the matching entry in
    `vocab_keys`, or -1 if no entry matches.  Tiles are chosen adaptively so
    that (a) each grid step does far more work than the fixed step overhead
    and (b) there are >= 2 query tiles whenever T allows (v7x megacore).
    """
    T = int(query_keys.shape[0])
    V = int(vocab_keys.shape[0])
    if T == 0:
        return jnp.zeros((0,), dtype=jnp.int32)
    if V == 0:
        return jnp.full((T,), -1, dtype=jnp.int32)

    # --- adaptive tile sizes -------------------------------------------------
    v_chunk = max(128, _round_up(v_chunk, 128))
    # query tile: lane-width multiple; prefer >= 2 tiles so the "parallel" axis
    # can be split across TensorCores on v7x.
    t_tile = max(128, _round_up(t_tile, 128))
    t_tile = max(128, min(t_tile, _round_up(-(-T // 2), 128)))
    # vocab tile: multiple of the chunk size, capped at the padded vocab size.
    v_tile = max(v_chunk, _round_up(v_tile, v_chunk))
    v_tile = max(v_chunk, min(v_tile, _round_up(V, v_chunk)))

    n_t = -(-T // t_tile)
    n_v = -(-V // v_tile)
    t_pad = n_t * t_tile
    v_pad = n_v * v_tile

    q = jnp.full((t_pad,), _PAD_QUERY_KEY, dtype=jnp.int32)
    q = q.at[:T].set(query_keys.astype(jnp.int32))
    k = jnp.full((v_pad,), _PAD_VOCAB_KEY, dtype=jnp.int32)
    k = k.at[:V].set(vocab_keys.astype(jnp.int32))

    qcol = q.reshape(t_pad, 1)     # queries as a sublane column (loaded once per tile)
    krow = k.reshape(1, v_pad)     # vocab keys lane-dense (contiguous DMA)

    out = pl.pallas_call(
        functools.partial(_lookup_kernel, v_chunk=v_chunk),
        out_shape=jax.ShapeDtypeStruct((t_pad, 1), jnp.int32),
        grid_spec=pltpu.PrefetchScalarGridSpec(
            num_scalar_prefetch=0,
            grid=(n_t, n_v),                          # vocab (reduction) axis last
            in_specs=[
                pl.BlockSpec((t_tile, 1), lambda i, j: (i, 0)),
                pl.BlockSpec((1, v_tile), lambda i, j: (0, j)),
            ],
            out_specs=pl.BlockSpec((t_tile, 1), lambda i, j: (i, 0)),
            scratch_shapes=[pltpu.VMEM((t_tile, 1), jnp.int32)],
        ),
        compiler_params=pltpu.CompilerParams(
            dimension_semantics=("parallel", "arbitrary"),
            vmem_limit_bytes=32 * 1024 * 1024,
        ),
    )(qcol, krow)
    return out.reshape(t_pad)[:T]


class PallasVocab:
    """Mirror of the PyTorch Vocab module with the forward lookup on TPU."""

    def __init__(self, stoi, *, t_tile=512, v_tile=2048, v_chunk=256):
        self.stoi = dict(stoi)
        self._t_tile = t_tile
        self._v_tile = v_tile
        self._v_chunk = v_chunk
        self._rebuild_tables()

    # -- host-side tables ----------------------------------------------------
    def _rebuild_tables(self):
        tokens = list(self.stoi.keys())
        vals = [self.stoi[t] for t in tokens]

        keys = [_token_hash(t) for t in tokens]
        assert len(set(keys)) == len(keys), "hash collision in vocab keys"
        self._hash_of = {t: h for t, h in zip(tokens, keys)}
        self.vocab_keys = (jnp.asarray(keys, dtype=jnp.int32)
                           if keys else jnp.zeros((0,), jnp.int32))

        # torchtext-style vocab: stoi values are 0..V-1 in insertion order, so the
        # kernel's positions ARE the indices and no values table is gathered.
        self._identity_values = vals == list(range(len(vals)))
        self.vocab_vals = (jnp.asarray(vals, dtype=jnp.int32)
                           if vals else jnp.zeros((0,), jnp.int32))

        # index -> token map (correct even when stoi values are not insertion order)
        if vals and sorted(vals) == list(range(len(vals))):
            itos = [None] * len(vals)
            for t, i in self.stoi.items():
                itos[i] = t
            self.itos = itos
        else:
            self.itos = tokens

    # -- dict-style API (host side, matches the PyTorch module) ---------------
    def __len__(self):
        return len(self.stoi)

    def __contains__(self, token):
        return token in self.stoi

    def __getitem__(self, token):
        return self.stoi[token]

    def insert_token(self, token, index):
        if token not in self.stoi:
            self.stoi[token] = index
            self._rebuild_tables()

    def lookup_token(self, index):
        return self.itos[index]

    def lookup_tokens(self, indices):
        return [self.itos[i] for i in indices]

    def get_stoi(self):
        return self.stoi

    def get_itos(self):
        return self.itos

    # -- forward: the TPU lookup ----------------------------------------------
    def forward(self, tokens):
        """tokens: list of strings -> (T,) int32 device array of indices."""
        if len(tokens) == 0:
            return jnp.zeros((0,), dtype=jnp.int32)
        # Host-side glue: strings -> deterministic int32 keys (raises KeyError for
        # out-of-vocab tokens, matching the PyTorch module's dict-lookup semantics).
        # The device kernel pays off when hashed query keys already live on device.
        qkeys = jnp.asarray([self._hash_of[t] for t in tokens], dtype=jnp.int32)
        pos = pallas_lookup_positions(qkeys, self.vocab_keys,
                                      t_tile=self._t_tile, v_tile=self._v_tile,
                                      v_chunk=self._v_chunk)
        if self._identity_values:
            return pos
        # general stoi values: cheap device-side gather, guarded against misses (-1)
        gathered = jnp.take(self.vocab_vals, jnp.maximum(pos, 0))
        return jnp.where(pos >= 0, gathered, jnp.int32(-1))

    lookup_indices = forward
    __call__ = forward


if __name__ == "__main__":
    # Deterministic synthetic vocab: 600 tokens (indices follow dict order),
    # 200 query tokens -> grid of (2 query tiles) x (1 vocab tile, 3 chunks).
    V = 600
    T = 200
    stoi = {f"tok_{i}": i for i in range(V)}
    vocab = PallasVocab(stoi)

    key = jax.random.PRNGKey(0)
    sel = jax.random.randint(key, (T,), 0, V)
    tokens = [f"tok_{int(i)}" for i in sel]

    out = vocab(tokens)
    out = jax.block_until_ready(out)

    expected = [stoi[t] for t in tokens]   # reference: PyTorch forward semantics
    got = [int(x) for x in out]
    assert got == expected, (got[:8], expected[:8])

    # also exercise the standalone device-key path (miss -> -1)
    qk = jnp.concatenate([vocab.vocab_keys[:5], jnp.asarray([123456789], jnp.int32)])
    pos = jax.block_until_ready(pallas_lookup_positions(qk, vocab.vocab_keys))
    assert [int(x) for x in pos] == [0, 1, 2, 3, 4, -1], pos

    print("KERNEL_OK")
</pallas_src>

<mosaic_0001>
module attributes {stable_mosaic.version = 11 : i64} {
  func.func @_lookup_kernel(%arg0: i32, %arg1: i32, %arg2: memref<128x1xi32, #tpu.memory_space<vmem>>, %arg3: memref<1x768xi32, #tpu.memory_space<vmem>>, %arg4: memref<128x1xi32, #tpu.memory_space<vmem>>, %arg5: memref<128x1xi32, #tpu.memory_space<vmem>>) attributes {dimension_semantics = [#tpu.dimension_semantics<parallel>, #tpu.dimension_semantics<arbitrary>], iteration_bounds = array<i64: 2, 1>, scalar_prefetch = 0 : i64, scratch_operands = 1 : i64, tpu.core_type = #tpu.core_type<tc>, window_params = [{transform_indices = @transform_0, window_bounds = array<i64: 128, 1>}, {transform_indices = @transform_1, window_bounds = array<i64: 1, 768>}, {transform_indices = @transform_2, window_bounds = array<i64: 128, 1>}]} {
    %c0_i32 = arith.constant 0 : i32
    %0 = arith.cmpi eq, %arg1, %c0_i32 : i32
    %1 = arith.extui %0 : i1 to i32
    %c0_i32_0 = arith.constant 0 : i32
    %2 = arith.cmpi ne, %1, %c0_i32_0 : i32
    scf.if %2 {
      %c-1_i32_21 = arith.constant -1 : i32
      %62 = vector.broadcast %c-1_i32_21 : i32 to vector<128x1xi32>
      %c0_22 = arith.constant 0 : index
      %c0_23 = arith.constant 0 : index
      %63 = vector.load %arg5[%c0_22, %c0_23] : memref<128x1xi32, #tpu.memory_space<vmem>>, vector<128x1xi32>
      tpu.vector_store %arg5[%c0_22, %c0_23], %62 {strides = array<i32>} : memref<128x1xi32, #tpu.memory_space<vmem>>, vector<128x1xi32>,
    } else {
    }
    %c0 = arith.constant 0 : index
    %c0_1 = arith.constant 0 : index
    %3 = vector.load %arg2[%c0, %c0_1] : memref<128x1xi32, #tpu.memory_space<vmem>>, vector<128x1xi32>
    %c768_i32 = arith.constant 768 : i32
    %4 = arith.muli %arg1, %c768_i32 : i32
    %5 = tpu.iota {dimensions = array<i32: 1>} : vector<128x256xi32>
    %c0_2 = arith.constant 0 : index
    %c0_3 = arith.constant 0 : index
    %6 = vector.load %arg5[%c0_2, %c0_3] : memref<128x1xi32, #tpu.memory_space<vmem>>, vector<128x1xi32>
    %c0_i32_4 = arith.constant 0 : i32
    %c256_i32 = arith.constant 256 : i32
    %7 = arith.muli %c0_i32_4, %c256_i32 : i32
    %8 = tpu.assume_multiple %7, 256 : i32
    %c0_5 = arith.constant 0 : index
    %9 = arith.index_cast %8 : i32 to index
    %10 = vector.load %arg3[%c0_5, %9] : memref<1x768xi32, #tpu.memory_space<vmem>>, vector<1x256xi32>
    %11 = vector.broadcast %3 : vector<128x1xi32> to vector<128x256xi32>
    %12 = vector.broadcast %10 : vector<1x256xi32> to vector<128x256xi32>
    %13 = arith.cmpi eq, %11, %12 : vector<128x256xi32>
    %c-1_i32 = arith.constant -1 : i32
    %14 = vector.broadcast %c-1_i32 : i32 to vector<128x256xi32>
    %15 = arith.select %13, %5, %14 : vector<128x256xi1>, vector<128x256xi32>
    %cst = arith.constant dense<-2147483648> : vector<128xi32>
    %16 = vector.multi_reduction <maxsi>, %15, %cst [1] : vector<128x256xi32> to vector<128xi32>
    %17 = vector.shape_cast %16 : vector<128xi32> to vector<128x1xi32>
    %c0_i32_6 = arith.constant 0 : i32
    %18 = vector.broadcast %c0_i32_6 : i32 to vector<128x1xi32>
    %19 = arith.cmpi sge, %17, %18 : vector<128x1xi32>
    %20 = arith.addi %4, %8 : i32
    %21 = vector.broadcast %20 : i32 to vector<128x1xi32>
    %22 = arith.addi %17, %21 : vector<128x1xi32>
    %23 = arith.select %19, %22, %6 : vector<128x1xi1>, vector<128x1xi32>
    %c1_i32 = arith.constant 1 : i32
    %c256_i32_7 = arith.constant 256 : i32
    %24 = arith.muli %c1_i32, %c256_i32_7 : i32
    %25 = tpu.assume_multiple %24, 256 : i32
    %c0_8 = arith.constant 0 : index
    %26 = arith.index_cast %25 : i32 to index
    %27 = vector.load %arg3[%c0_8, %26] : memref<1x768xi32, #tpu.memory_space<vmem>>, vector<1x256xi32>
    %28 = vector.broadcast %3 : vector<128x1xi32> to vector<128x256xi32>
    %29 = vector.broadcast %27 : vector<1x256xi32> to vector<128x256xi32>
    %30 = arith.cmpi eq, %28, %29 : vector<128x256xi32>
    %c-1_i32_9 = arith.constant -1 : i32
    %31 = vector.broadcast %c-1_i32_9 : i32 to vector<128x256xi32>
    %32 = arith.select %30, %5, %31 : vector<128x256xi1>, vector<128x256xi32>
    %cst_10 = arith.constant dense<-2147483648> : vector<128xi32>
    %33 = vector.multi_reduction <maxsi>, %32, %cst_10 [1] : vector<128x256xi32> to vector<128xi32>
    %34 = vector.shape_cast %33 : vector<128xi32> to vector<128x1xi32>
    %c0_i32_11 = arith.constant 0 : i32
    %35 = vector.broadcast %c0_i32_11 : i32 to vector<128x1xi32>
    %36 = arith.cmpi sge, %34, %35 : vector<128x1xi32>
    %37 = arith.addi %4, %25 : i32
    %38 = vector.broadcast %37 : i32 to vector<128x1xi32>
    %39 = arith.addi %34, %38 : vector<128x1xi32>
    %40 = arith.select %36, %39, %23 : vector<128x1xi1>, vector<128x1xi32>
    %c2_i32 = arith.constant 2 : i32
    %c256_i32_12 = arith.constant 256 : i32
    %41 = arith.muli %c2_i32, %c256_i32_12 : i32
    %42 = tpu.assume_multiple %41, 256 : i32
    %c0_13 = arith.constant 0 : index
    %43 = arith.index_cast %42 : i32 to index
    %44 = vector.load %arg3[%c0_13, %43] : memref<1x768xi32, #tpu.memory_space<vmem>>, vector<1x256xi32>
    %45 = vector.broadcast %3 : vector<128x1xi32> to vector<128x256xi32>
    %46 = vector.broadcast %44 : vector<1x256xi32> to vector<128x256xi32>
    %47 = arith.cmpi eq, %45, %46 : vector<128x256xi32>
    %c-1_i32_14 = arith.constant -1 : i32
    %48 = vector.broadcast %c-1_i32_14 : i32 to vector<128x256xi32>
    %49 = arith.select %47, %5, %48 : vector<128x256xi1>, vector<128x256xi32>
    %cst_15 = arith.constant dense<-2147483648> : vector<128xi32>
    %50 = vector.multi_reduction <maxsi>, %49, %cst_15 [1] : vector<128x256xi32> to vector<128xi32>
    %51 = vector.shape_cast %50 : vector<128xi32> to vector<128x1xi32>
    %c0_i32_16 = arith.constant 0 : i32
    %52 = vector.broadcast %c0_i32_16 : i32 to vector<128x1xi32>
    %53 = arith.cmpi sge, %51, %52 : vector<128x1xi32>
    %54 = arith.addi %4, %42 : i32
    %55 = vector.broadcast %54 : i32 to vector<128x1xi32>
    %56 = arith.addi %51, %55 : vector<128x1xi32>
    %57 = arith.select %53, %56, %40 : vector<128x1xi1>, vector<128x1xi32>
    %c3_i32 = arith.constant 3 : i32
    %c0_17 = arith.constant 0 : index
    %c0_18 = arith.constant 0 : index
    %58 = vector.load %arg5[%c0_17, %c0_18] : memref<128x1xi32, #tpu.memory_space<vmem>>, vector<128x1xi32>
    tpu.vector_store %arg5[%c0_17, %c0_18], %57 {strides = array<i32>} : memref<128x1xi32, #tpu.memory_space<vmem>>, vector<128x1xi32>,
    %c0_i32_19 = arith.constant 0 : i32
    %59 = arith.cmpi eq, %arg1, %c0_i32_19 : i32
    %60 = arith.extui %59 : i1 to i32
    %c0_i32_20 = arith.constant 0 : i32
    %61 = arith.cmpi ne, %60, %c0_i32_20 : i32
    scf.if %61 {
      %c0_21 = arith.constant 0 : index
      %c0_22 = arith.constant 0 : index
      %62 = vector.load %arg5[%c0_21, %c0_22] : memref<128x1xi32, #tpu.memory_space<vmem>>, vector<128x1xi32>
      %c0_23 = arith.constant 0 : index
      %c0_24 = arith.constant 0 : index
      %63 = vector.load %arg4[%c0_23, %c0_24] : memref<128x1xi32, #tpu.memory_space<vmem>>, vector<128x1xi32>
      tpu.vector_store %arg4[%c0_23, %c0_24], %62 {strides = array<i32>} : memref<128x1xi32, #tpu.memory_space<vmem>>, vector<128x1xi32>,
    } else {
    }
    return
  }
  func.func @transform_0(%arg0: i32, %arg1: i32) -> (i32, i32) {
    %c0_i32 = arith.constant 0 : i32
    %c0_i32_0 = arith.constant 0 : i32
    return %arg0, %c0_i32 : i32, i32
  }
  func.func @transform_1(%arg0: i32, %arg1: i32) -> (i32, i32) {
    %c0_i32 = arith.constant 0 : i32
    %c0_i32_0 = arith.constant 0 : i32
    return %c0_i32, %arg1 : i32, i32
  }
  func.func @transform_2(%arg0: i32, %arg1: i32) -> (i32, i32) {
    %c0_i32 = arith.constant 0 : i32
    %c0_i32_0 = arith.constant 0 : i32
    return %arg0, %c0_i32 : i32, i32
  }
}

</mosaic_0001>

<bundles_post_ra>
// kernel: tpu_custom_call.1
= control target key start
LH: loop header
LB: loop body
LE: loop exit
PB: predicated region body
PF: predicated region fallthrough
CT: control target
= control target key end

     0   :  { %s1634_s9 = smov 0   ;;  %s1636_s10 = smov 0   ;;  %s2832_s0 = inlined_call_operand.vmem [shape: s32[256,1], index: 0, kind: input, shape index: {}]   ;;  %s2833_s1 = inlined_call_operand.vmem [shape: s32[1,768], index: 1, kind: input, shape index: {}]   ;;  %s2834_s2 = inlined_call_operand.vmem [shape: s32[256,1], index: 2, kind: output, shape index: {}]  }
   0x1   :  { %s1638_s11 = smov 0  }
   0x2 LB: > { %s24_s12 = sadd.s32 1, %s1611_s10  ;;  %p1556_p0 = scmp.ge.s32.totalorder %s1615_s11, 1  ;;  %s1615_s11 = sphi %s1638_s11, %s12_s11   ;;  %s1611_s10 = sphi %s1636_s10, %s2989_s10   ;;  %s1607_s9 = sphi %s1634_s9, %s2988_s9  }
   0x3   : > { %p26_p1 = scmp.ge.s32.totalorder %s24_s12, 2  ;;  %p135_p2 = scmp.lt.s32.totalorder %s1615_s11, 3 }
   0x5   : > { %s2991_s12 = smov (%p26_p1, %s24_s12), 0  ;;  %p136_p3 = pnand %p1556_p0, %p135_p2 }
   0x7   : > { %139 = sbr.rel (%p136_p3) target bundleno = 569 (0x239), region = 28 }
   0xe   : > { %s1557_s13 = sshll.u32 %s1607_s9, 4  ;;  %v1617_v0 = vmov 0   ;;  %v216_v17 = vlaneseq  ;;  %v235_v22 = vld [vmem:[%s2833_s1] sm:$0x3]  ;;  %v1561_v25 = vld [vmem:[%s2833_s1 + $0x2] sm:$0x3] }
   0xf   : > { %1592 = vset.pattern.permute.xlu1 %v1617_v0  ;;  %1591 = vset.pattern.permute.xlu0 %v1617_v0  ;;  %p162_p4 = scmp.lt.s32.totalorder %s1557_s13, 31  ;;  %v1562_v30 = vld [vmem:[%s2833_s1 + $0x4] sm:$0x3] }
  0x10   : > { %v285_v18 = vshrl.u32 %v216_v17, 7  ;;  %v1660_v21 = vand.u32 127, %v216_v17 }
  0x11   : > { %s2993_s13 = smov (!%p162_p4, %s1557_s13), 31 }
  0x12   : > { %s1558_s14 = sshll.u32 %s2993_s13, 3  ;;  %v286_v19 = vsub.s32 0, %v285_v18  ;;  %v290_v20 = vsub.s32 1, %v285_v18  ;;  %v1673_v26 = vadd.s32 128, %v1660_v21 }
  0x13   : > { %s165_s17 = scalar_lea.vmem %s2832_s0, %s1558_s14  ;;  %s2741_s26 = scalar_lea.vmem %s2834_s2, %s1558_s14 }
  0x14   : > { %v201_v1 = vld [vmem:[%s165_s17 + $0x10] sm:$0xff]  ;;  %v199_v2 = vld [vmem:[%s165_s17] sm:$0xff]  ;;  %v202_v3 = vld [vmem:[%s165_s17 + $0x18] sm:$0xff]  ;;  %v1665_v23 = vrot.slane %v235_v22, %v286_v19  ;;  %v1667_v24 = vrot.slane %v235_v22, %v290_v20  ;;  %v1679_v29 = vrot.slane %v1561_v25, %v286_v19  ;;  %v1696_v35 = vrot.slane %v1561_v25, %v290_v20 }
  0x15   : > { %243 = vperm.xlu1 %1592, %v201_v1   ;;  %237 = vperm.xlu0 %1591, %v199_v2   ;;  %v200_v4 = vld [vmem:[%s165_s17 + $0x8] sm:$0xff]  ;;  %v203_v6 = vld [vmem:[%s165_s17 + $0x20] sm:$0xff]  ;;  %v206_v7 = vld [vmem:[%s165_s17 + $0x38] sm:$0xff]  ;;  %v1698_v36 = vrot.slane %v1562_v30, %v286_v19  ;;  %v1710_v41 = vrot.slane %v1562_v30, %v290_v20 }
  0x16   : > { %v204_v5 = vld [vmem:[%s165_s17 + $0x28] sm:$0xff]  ;;  %v205_v8 = vld [vmem:[%s165_s17 + $0x30] sm:$0xff]  ;;  %v207_v10 = vld [vmem:[%s165_s17 + $0x40] sm:$0xff] }
  0x17   : > { %v208_v9 = vld [vmem:[%s165_s17 + $0x48] sm:$0xff]  ;;  %v210_v11 = vld [vmem:[%s165_s17 + $0x58] sm:$0xff]  ;;  %v209_v12 = vld [vmem:[%s165_s17 + $0x50] sm:$0xff] }
  0x18   : > { %v212_v13 = vld [vmem:[%s165_s17 + $0x68] sm:$0xff]  ;;  %v211_v14 = vld [vmem:[%s165_s17 + $0x60] sm:$0xff]  ;;  %v214_v15 = vld [vmem:[%s165_s17 + $0x78] sm:$0xff] }
  0x19   : > { %246 = vperm.xlu1 %1592, %v202_v3   ;;  %240 = vperm.xlu0 %1591, %v200_v4   ;;  %v213_v16 = vld [vmem:[%s165_s17 + $0x70] sm:$0xff] }
  0x1d   : > { %252 = vperm.xlu1 %1592, %v204_v5   ;;  %249 = vperm.xlu0 %1591, %v203_v6  }
  0x21   : > { %258 = vperm.xlu1 %1592, %v206_v7   ;;  %255 = vperm.xlu0 %1591, %v205_v8  }
  0x25   : > { %264 = vperm.xlu1 %1592, %v208_v9   ;;  %261 = vperm.xlu0 %1591, %v207_v10  }
  0x29   : > { %270 = vperm.xlu1 %1592, %v210_v11   ;;  %267 = vperm.xlu0 %1591, %v209_v12  }
  0x2d   : > { %276 = vperm.xlu1 %1592, %v212_v13   ;;  %273 = vperm.xlu0 %1591, %v211_v14  }
  0x31   : > { %282 = vperm.xlu1 %1592, %v214_v15   ;;  %279 = vperm.xlu0 %1591, %v213_v16  }
  0x94   : > { %v1675_v27 = vpop.permute.xlu1 %243  ;;  %v1677_v28 = vpop.permute.xlu0 %237 }
  0x95   : > { %vm296_vm0 = vcmp.eq.s32.totalorder %v1675_v27, %v1665_v23  ;;  %vm297_vm1 = vcmp.eq.s32.totalorder %v1675_v27, %v1667_v24  ;;  %vm292_vm2 = vcmp.eq.s32.totalorder %v1677_v28, %v1665_v23  ;;  %vm293_vm3 = vcmp.eq.s32.totalorder %v1677_v28, %v1667_v24 }
  0x96   : > { %v328_v31 = vsel %vm296_vm0, %v1660_v21, 4294967295  ;;  %v329_v32 = vsel %vm297_vm1, %v1673_v26, 4294967295  ;;  %v324_v33 = vsel %vm292_vm2, %v1660_v21, 4294967295  ;;  %v325_v34 = vsel %vm293_vm3, %v1673_v26, 4294967295 }
  0x97   : > { %vm388_vm4 = vcmp.gt.s32.totalorder %v328_v31, %v329_v32  ;;  %vm356_vm5 = vcmp.gt.s32.totalorder %v324_v33, %v325_v34  ;;  %vm672_vm6 = vcmp.eq.s32.totalorder %v1677_v28, %v1679_v29  ;;  %vm673_vm12 = vcmp.eq.s32.totalorder %v1677_v28, %v1696_v35 }
  0x98   : > { %v1700_v37 = vpop.permute.xlu1 %246  ;;  %v1702_v38 = vpop.permute.xlu0 %240  ;;  %v1704_v39 = vsel %vm388_vm4, %v328_v31, %v329_v32  ;;  %v1706_v40 = vsel %vm356_vm5, %v324_v33, %v325_v34  ;;  %v704_v53 = vsel %vm672_vm6, %v1660_v21, 4294967295  ;;  %v705_v1 = vsel %vm673_vm12, %v1673_v26, 4294967295 }
  0x99   : > { %v391_v42 = vshra.s32 %v1704_v39, 16  ;;  %v359_v43 = vshra.s32 %v1706_v40, 16  ;;  %vm298_vm7 = vcmp.eq.s32.totalorder %v1700_v37, %v1665_v23  ;;  %vm299_vm8 = vcmp.eq.s32.totalorder %v1700_v37, %v1667_v24 }
  0x9a   : > { %v330_v44 = vsel %vm298_vm7, %v1660_v21, 4294967295  ;;  %v331_v45 = vsel %vm299_vm8, %v1673_v26, 4294967295  ;;  %vm294_vm9 = vcmp.eq.s32.totalorder %v1702_v38, %v1665_v23  ;;  %vm295_vm10 = vcmp.eq.s32.totalorder %v1702_v38, %v1667_v24 }
  0x9b   : > { %v1724_v46 = vcvt.s32.f32 %v391_v42  ;;  %v1726_v47 = vcvt.s32.f32 %v359_v43  ;;  %vm404_vm11 = vcmp.gt.s32.totalorder %v330_v44, %v331_v45  ;;  %v326_v48 = vsel %vm294_vm9, %v1660_v21, 4294967295 }
  0x9c   : > { %v1729_v49 = vpop.permute.xlu1 %252  ;;  %v1731_v50 = vpop.permute.xlu0 %249  ;;  %v1733_v51 = vsel %vm404_vm11, %v330_v44, %v331_v45  ;;  %v327_v52 = vsel %vm295_vm10, %v1673_v26, 4294967295  ;;  %vm736_vm9 = vcmp.gt.s32.totalorder %v704_v53, %v705_v1 }
  0x9d   : > { %394 = vmax.xlane.f32.xlu1 %v1724_v46  ;;  %362 = vmax.xlane.f32.xlu0 %v1726_v47  ;;  %v407_v54 = vshra.s32 %v1733_v51, 16  ;;  %vm372_vm13 = vcmp.gt.s32.totalorder %v326_v48, %v327_v52  ;;  %vm300_vm14 = vcmp.eq.s32.totalorder %v1731_v50, %v1665_v23  ;;  %vm301_vm15 = vcmp.eq.s32.totalorder %v1731_v50, %v1667_v24 }
  0x9e   : > { %v1749_v55 = vsel %vm372_vm13, %v326_v48, %v327_v52  ;;  %v332_v56 = vsel %vm300_vm14, %v1660_v21, 4294967295  ;;  %v333_v57 = vsel %vm301_vm15, %v1673_v26, 4294967295  ;;  %vm302_vm0 = vcmp.eq.s32.totalorder %v1729_v49, %v1665_v23 }
  0x9f   : > { %v1755_v58 = vcvt.s32.f32 %v407_v54  ;;  %v375_v59 = vshra.s32 %v1749_v55, 16  ;;  %vm420_vm1 = vcmp.gt.s32.totalorder %v332_v56, %v333_v57  ;;  %vm303_vm2 = vcmp.eq.s32.totalorder %v1729_v49, %v1667_v24 }
  0xa0   : > { %v1760_v60 = vpop.permute.xlu1 %258  ;;  %v1762_v61 = vpop.permute.xlu0 %255  ;;  %v1764_v62 = vsel %vm420_vm1, %v332_v56, %v333_v57  ;;  %v334_v63 = vsel %vm302_vm0, %v1660_v21, 4294967295  ;;  %v335_v0 = vsel %vm303_vm2, %v1673_v26, 4294967295  ;;  %v1825_v31 = vsel %vm736_vm9, %v704_v53, %v705_v1 }
  0xa1   : > { %410 = vmax.xlane.f32.xlu1 %v1755_v58  ;;  %v1773_v2 = vcvt.s32.f32 %v375_v59  ;;  %v423_v3 = vshra.s32 %v1764_v62, 16  ;;  %vm436_vm3 = vcmp.gt.s32.totalorder %v334_v63, %v335_v0  ;;  %vm304_vm4 = vcmp.eq.s32.totalorder %v1762_v61, %v1665_v23 }
  0xa2   : > { %v1778_v4 = vsel %vm436_vm3, %v334_v63, %v335_v0  ;;  %vm305_vm5 = vcmp.eq.s32.totalorder %v1762_v61, %v1667_v24  ;;  %v336_v5 = vsel %vm304_vm4, %v1660_v21, 4294967295  ;;  %vm306_vm6 = vcmp.eq.s32.totalorder %v1760_v60, %v1665_v23 }
  0xa3   : > { %378 = vmax.xlane.f32.xlu0 %v1773_v2  ;;  %v1786_v6 = vcvt.s32.f32 %v423_v3  ;;  %v439_v7 = vshra.s32 %v1778_v4, 16  ;;  %v337_v8 = vsel %vm305_vm5, %v1673_v26, 4294967295  ;;  %vm307_vm7 = vcmp.eq.s32.totalorder %v1760_v60, %v1667_v24 }
  0xa4   : > { %v1792_v9 = vpop.permute.xlu1 %264  ;;  %v1794_v10 = vpop.permute.xlu0 %261  ;;  %vm452_vm8 = vcmp.gt.s32.totalorder %v336_v5, %v337_v8  ;;  %v338_v11 = vsel %vm306_vm6, %v1660_v21, 4294967295  ;;  %v339_v12 = vsel %vm307_vm7, %v1673_v26, 4294967295  ;;  %vm676_vm5 = vcmp.eq.s32.totalorder %v1675_v27, %v1679_v29 }
  0xa5   : > { %426 = vmax.xlane.f32.xlu1 %v1786_v6  ;;  %v1799_v13 = vcvt.s32.f32 %v439_v7  ;;  %v1801_v14 = vsel %vm452_vm8, %v336_v5, %v337_v8  ;;  %vm308_vm10 = vcmp.eq.s32.totalorder %v1794_v10, %v1665_v23  ;;  %vm309_vm11 = vcmp.eq.s32.totalorder %v1794_v10, %v1667_v24 }
  0xa6   : > { %v455_v15 = vshra.s32 %v1801_v14, 16  ;;  %v340_v16 = vsel %vm308_vm10, %v1660_v21, 4294967295  ;;  %v341_v17 = vsel %vm309_vm11, %v1673_v26, 4294967295  ;;  %vm468_vm12 = vcmp.gt.s32.totalorder %v338_v11, %v339_v12 }
  0xa7   : > { %vm484_vm13 = vcmp.gt.s32.totalorder %v340_v16, %v341_v17  ;;  %v1810_v18 = vsel %vm468_vm12, %v338_v11, %v339_v12  ;;  %vm310_vm14 = vcmp.eq.s32.totalorder %v1792_v9, %v1665_v23  ;;  %vm311_vm15 = vcmp.eq.s32.totalorder %v1792_v9, %v1667_v24 }
  0xa8   : > { %v1816_v19 = vpop.permute.xlu1 %270  ;;  %v1818_v20 = vpop.permute.xlu0 %267  ;;  %v1820_v22 = vsel %vm484_vm13, %v340_v16, %v341_v17  ;;  %v471_v25 = vshra.s32 %v1810_v18, 16  ;;  %v342_v30 = vsel %vm310_vm14, %v1660_v21, 4294967295  ;;  %v343_v33 = vsel %vm311_vm15, %v1673_v26, 4294967295 }
  0xa9   : > { %442 = vmax.xlane.f32.xlu1 %v1799_v13  ;;  %v487_v32 = vshra.s32 %v1820_v22, 16  ;;  %vm312_vm0 = vcmp.eq.s32.totalorder %v1818_v20, %v1665_v23  ;;  %vm313_vm1 = vcmp.eq.s32.totalorder %v1818_v20, %v1667_v24  ;;  %v1834_v34 = vcvt.s32.f32 %v455_v15 }
  0xaa   : > { %v344_v42 = vsel %vm312_vm0, %v1660_v21, 4294967295  ;;  %v345_v43 = vsel %vm313_vm1, %v1673_v26, 4294967295  ;;  %vm500_vm2 = vcmp.gt.s32.totalorder %v342_v30, %v343_v33  ;;  %vm314_vm4 = vcmp.eq.s32.totalorder %v1816_v19, %v1665_v23 }
  0xab   : > { %v1838_v44 = vcvt.s32.f32 %v487_v32  ;;  %vm516_vm3 = vcmp.gt.s32.totalorder %v344_v42, %v345_v43  ;;  %v1840_v45 = vsel %vm500_vm2, %v342_v30, %v343_v33  ;;  %v1850_v53 = vcvt.s32.f32 %v471_v25 }
  0xac   : > { %v1846_v48 = vpop.permute.xlu1 %276  ;;  %v1848_v52 = vpop.permute.xlu0 %273  ;;  %v1852_v54 = vsel %vm516_vm3, %v344_v42, %v345_v43  ;;  %vm315_vm6 = vcmp.eq.s32.totalorder %v1816_v19, %v1667_v24  ;;  %v346_v56 = vsel %vm314_vm4, %v1660_v21, 4294967295  ;;  %v503_v63 = vshra.s32 %v1840_v45, 16 }
  0xad   : > { %458 = vmax.xlane.f32.xlu1 %v1834_v34  ;;  %490 = vmax.xlane.f32.xlu0 %v1838_v44  ;;  %v519_v57 = vshra.s32 %v1852_v54, 16  ;;  %vm316_vm7 = vcmp.eq.s32.totalorder %v1848_v52, %v1665_v23  ;;  %vm317_vm8 = vcmp.eq.s32.totalorder %v1848_v52, %v1667_v24  ;;  %v347_v59 = vsel %vm315_vm6, %v1673_v26, 4294967295 }
  0xae   : > { %v348_v0 = vsel %vm316_vm7, %v1660_v21, 4294967295  ;;  %v349_v1 = vsel %vm317_vm8, %v1673_v26, 4294967295  ;;  %vm532_vm9 = vcmp.gt.s32.totalorder %v346_v56, %v347_v59  ;;  %vm318_vm11 = vcmp.eq.s32.totalorder %v1846_v48, %v1665_v23 }
  0xaf   : > { %v1868_v3 = vcvt.s32.f32 %v519_v57  ;;  %vm548_vm10 = vcmp.gt.s32.totalorder %v348_v0, %v349_v1  ;;  %v1870_v5 = vsel %vm532_vm9, %v346_v56, %v347_v59  ;;  %vm319_vm12 = vcmp.eq.s32.totalorder %v1846_v48, %v1667_v24 }
  0xb0   : > { %2886 = vst [vmem:[#allocation3_spill] sm:$0xff] %v1870_v5  ;;  %v1874_v7 = vpop.permute.xlu0 %279  ;;  %v1876_v8 = vsel %vm548_vm10, %v348_v0, %v349_v1  ;;  %v535_v11 = vshra.s32 %v1870_v5, 16  ;;  %v350_v12 = vsel %vm318_vm11, %v1660_v21, 4294967295  ;;  %v1882_v15 = vpop.permute.xlu1 %282  ;;  %v351_v17 = vsel %vm319_vm12, %v1673_v26, 4294967295 }
  0xb1   : > { %474 = vmax.xlane.f32.xlu1 %v1850_v53  ;;  %522 = vmax.xlane.f32.xlu0 %v1868_v3  ;;  %v551_v16 = vshra.s32 %v1876_v8, 16  ;;  %vm320_vm13 = vcmp.eq.s32.totalorder %v1874_v7, %v1665_v23  ;;  %vm321_vm14 = vcmp.eq.s32.totalorder %v1874_v7, %v1667_v24  ;;  %vm564_vm15 = vcmp.gt.s32.totalorder %v350_v12, %v351_v17 }
  0xb2   : > { %v352_v25 = vsel %vm320_vm13, %v1660_v21, 4294967295  ;;  %v353_v30 = vsel %vm321_vm14, %v1673_v26, 4294967295  ;;  %v739_v32 = vshra.s32 %v1825_v31, 16  ;;  %v1895_v33 = vcvt.s32.f32 %v503_v63 }
  0xb3   : > { %v1897_v42 = vcvt.s32.f32 %v551_v16  ;;  %vm580_vm0 = vcmp.gt.s32.totalorder %v352_v25, %v353_v30  ;;  %v1899_v43 = vsel %vm564_vm15, %v350_v12, %v351_v17  ;;  %v1901_v56 = vcvt.s32.f32 %v535_v11 }
  0xb4   : > { %2887 = vst [vmem:[#allocation4_spill] sm:$0xff] %v1899_v43  ;;  %v1903_v57 = vsel %vm580_vm0, %v352_v25, %v353_v30  ;;  %vm322_vm1 = vcmp.eq.s32.totalorder %v1882_v15, %v1665_v23  ;;  %vm323_vm2 = vcmp.eq.s32.totalorder %v1882_v15, %v1667_v24  ;;  %vm677_vm3 = vcmp.eq.s32.totalorder %v1675_v27, %v1696_v35 }
  0xb5   : > { %2888 = vst [vmem:[#allocation5_spill] sm:$0xff] %v1901_v56  ;;  %506 = vmax.xlane.f32.xlu1 %v1895_v33  ;;  %554 = vmax.xlane.f32.xlu0 %v1897_v42  ;;  %v583_v59 = vshra.s32 %v1903_v57, 16  ;;  %v354_v63 = vsel %vm322_vm1, %v1660_v21, 4294967295  ;;  %v355_v0 = vsel %vm323_vm2, %v1673_v26, 4294967295  ;;  %v567_v1 = vshra.s32 %v1899_v43, 16 }
  0xb6   : > { %vm596_vm4 = vcmp.gt.s32.totalorder %v354_v63, %v355_v0  ;;  %v708_v23 = vsel %vm676_vm5, %v1660_v21, 4294967295  ;;  %v709_v24 = vsel %vm677_vm3, %v1673_v26, 4294967295  ;;  %vm674_vm7 = vcmp.eq.s32.totalorder %v1702_v38, %v1679_v29 }
  0xb7   : > { %v1922_v11 = vcvt.s32.f32 %v583_v59  ;;  %v1924_v12 = vsel %vm596_vm4, %v354_v63, %v355_v0  ;;  %vm768_vm6 = vcmp.gt.s32.totalorder %v708_v23, %v709_v24  ;;  %v1928_v16 = vcvt.s32.f32 %v739_v32 }
  0xb8   : > { %2889 = vst [vmem:[#allocation6_spill] sm:$0xff] %v1924_v12  ;;  %v1930_v17 = vsel %vm768_vm6, %v708_v23, %v709_v24  ;;  %vm675_vm8 = vcmp.eq.s32.totalorder %v1702_v38, %v1696_v35  ;;  %v706_v25 = vsel %vm674_vm7, %v1660_v21, 4294967295  ;;  %v599_v30 = vshra.s32 %v1924_v12, 16 }
  0xb9   : > { %538 = vmax.xlane.f32.xlu1 %v1901_v56  ;;  %586 = vmax.xlane.f32.xlu0 %v1922_v11  ;;  %v707_v59 = vsel %vm675_vm8, %v1673_v26, 4294967295  ;;  %vm680_vm5 = vcmp.eq.s32.totalorder %v1731_v50, %v1679_v29  ;;  %vm681_vm9 = vcmp.eq.s32.totalorder %v1731_v50, %v1696_v35  ;;  %v1943_v32 = vcvt.s32.f32 %v567_v1 }
  0xba   : > { %vm752_vm10 = vcmp.gt.s32.totalorder %v706_v25, %v707_v59  ;;  %v712_v63 = vsel %vm680_vm5, %v1660_v21, 4294967295  ;;  %v713_v0 = vsel %vm681_vm9, %v1673_v26, 4294967295  ;;  %v771_v23 = vshra.s32 %v1930_v17, 16 }
  0xbb   : > { %2890 = vst [vmem:[#allocation7_spill] sm:$0xff] %v1943_v32  ;;  %v1948_v24 = vsel %vm752_vm10, %v706_v25, %v707_v59  ;;  %vm800_vm11 = vcmp.gt.s32.totalorder %v712_v63, %v713_v0  ;;  %vm678_vm12 = vcmp.eq.s32.totalorder %v1700_v37, %v1679_v29  ;;  %vm679_vm13 = vcmp.eq.s32.totalorder %v1700_v37, %v1696_v35 }
  0xbc   : > { %2891 = vst [vmem:[#allocation8_spill] sm:$0xff] %v1948_v24  ;;  %v755_v12 = vshra.s32 %v1948_v24, 16  ;;  %v1953_v43 = vsel %vm800_vm11, %v712_v63, %v713_v0  ;;  %v710_v1 = vsel %vm678_vm12, %v1660_v21, 4294967295  ;;  %v1960_v56 = vcvt.s32.f32 %v599_v30 }
  0xbd   : > { %2892 = vst [vmem:[#allocation9_spill] sm:$0xff] %v1953_v43  ;;  %570 = vmax.xlane.f32.xlu1 %v1943_v32  ;;  %742 = vmax.xlane.f32.xlu0 %v1928_v16  ;;  %v711_v25 = vsel %vm679_vm13, %v1673_v26, 4294967295  ;;  %vm684_vm14 = vcmp.eq.s32.totalorder %v1762_v61, %v1679_v29  ;;  %vm685_vm15 = vcmp.eq.s32.totalorder %v1762_v61, %v1696_v35  ;;  %v803_v59 = vshra.s32 %v1953_v43, 16 }
  0xbe   : > { %2893 = vst [vmem:[#allocation10_spill] sm:$0xff] %v1960_v56  ;;  %vm784_vm0 = vcmp.gt.s32.totalorder %v710_v1, %v711_v25  ;;  %v716_v63 = vsel %vm684_vm14, %v1660_v21, 4294967295  ;;  %v717_v0 = vsel %vm685_vm15, %v1673_v26, 4294967295  ;;  %v1970_v24 = vcvt.s32.f32 %v771_v23 }
  0xbf   : > { %v1972_v32 = vsel %vm784_vm0, %v710_v1, %v711_v25  ;;  %vm832_vm1 = vcmp.gt.s32.totalorder %v716_v63, %v717_v0  ;;  %vm682_vm2 = vcmp.eq.s32.totalorder %v1729_v49, %v1679_v29  ;;  %v1976_v30 = vcvt.s32.f32 %v755_v12 }
  0xc0   : > { %2894 = vst [vmem:[#allocation11_spill] sm:$0xff] %v1970_v24  ;;  %2895 = vst [vmem:[#allocation12_spill] sm:$0xff] %v1972_v32  ;;  %v1978_v5 = vsel %vm832_vm1, %v716_v63, %v717_v0  ;;  %vm683_vm3 = vcmp.eq.s32.totalorder %v1729_v49, %v1696_v35  ;;  %v714_v43 = vsel %vm682_vm2, %v1660_v21, 4294967295  ;;  %v787_v23 = vshra.s32 %v1972_v32, 16 }
  0xc1   : > { %2896 = vst [vmem:[#allocation13_spill] sm:$0xff] %v1976_v30  ;;  %2897 = vst [vmem:[#allocation14_spill] sm:$0xff] %v1978_v5  ;;  %602 = vmax.xlane.f32.xlu1 %v1960_v56  ;;  %774 = vmax.xlane.f32.xlu0 %v1970_v24  ;;  %v715_v1 = vsel %vm683_vm3, %v1673_v26, 4294967295  ;;  %vm688_vm4 = vcmp.eq.s32.totalorder %v1794_v10, %v1679_v29  ;;  %vm689_vm6 = vcmp.eq.s32.totalorder %v1794_v10, %v1696_v35 }
  0xc2   : > { %v1991_v12 = vcvt.s32.f32 %v803_v59  ;;  %vm816_vm7 = vcmp.gt.s32.totalorder %v714_v43, %v715_v1  ;;  %v720_v25 = vsel %vm688_vm4, %v1660_v21, 4294967295  ;;  %v721_v63 = vsel %vm689_vm6, %v1673_v26, 4294967295 }
  0xc3   : > { %v835_v0 = vshra.s32 %v1978_v5, 16  ;;  %v1996_v56 = vsel %vm816_vm7, %v714_v43, %v715_v1  ;;  %vm864_vm8 = vcmp.gt.s32.totalorder %v720_v25, %v721_v63  ;;  %vm686_vm5 = vcmp.eq.s32.totalorder %v1760_v60, %v1679_v29 }
  0xc4   : > { %2898 = vst [vmem:[#allocation15_spill] sm:$0xff] %v1991_v12  ;;  %2899 = vst [vmem:[#allocation16_spill] sm:$0xff] %v1996_v56  ;;  %v819_v32 = vshra.s32 %v1996_v56, 16  ;;  %v2001_v24 = vsel %vm864_vm8, %v720_v25, %v721_v63  ;;  %vm687_vm9 = vcmp.eq.s32.totalorder %v1760_v60, %v1696_v35  ;;  %v718_v59 = vsel %vm686_vm5, %v1660_v21, 4294967295 }
  0xc5   : > { %2900 = vst [vmem:[#allocation17_spill] sm:$0xff] %v2001_v24  ;;  %758 = vmax.xlane.f32.xlu1 %v1976_v30  ;;  %806 = vmax.xlane.f32.xlu0 %v1991_v12  ;;  %v2008_v5 = vcvt.s32.f32 %v787_v23  ;;  %v719_v43 = vsel %vm687_vm9, %v1673_v26, 4294967295  ;;  %vm692_vm10 = vcmp.eq.s32.totalorder %v1818_v20, %v1679_v29  ;;  %vm693_vm11 = vcmp.eq.s32.totalorder %v1818_v20, %v1696_v35 }
  0xc6   : > { %v867_v1 = vshra.s32 %v2001_v24, 16  ;;  %vm848_vm12 = vcmp.gt.s32.totalorder %v718_v59, %v719_v43  ;;  %v724_v25 = vsel %vm692_vm10, %v1660_v21, 4294967295  ;;  %v725_v63 = vsel %vm693_vm11, %v1673_v26, 4294967295 }
  0xc7   : > { %2901 = vst [vmem:[#allocation18_spill] sm:$0xff] %v2008_v5  ;;  %v2018_v56 = vcvt.s32.f32 %v835_v0  ;;  %v2020_v30 = vsel %vm848_vm12, %v718_v59, %v719_v43  ;;  %vm896_vm13 = vcmp.gt.s32.totalorder %v724_v25, %v725_v63  ;;  %vm690_vm14 = vcmp.eq.s32.totalorder %v1792_v9, %v1679_v29 }
  0xc8   : > { %2903 = vst [vmem:[#allocation20_spill] sm:$0xff] %v2020_v30  ;;  %v2024_v23 = vcvt.s32.f32 %v819_v32  ;;  %v2026_v12 = vsel %vm896_vm13, %v724_v25, %v725_v63  ;;  %vm691_vm15 = vcmp.eq.s32.totalorder %v1792_v9, %v1696_v35  ;;  %v722_v24 = vsel %vm690_vm14, %v1660_v21, 4294967295 }
  0xc9   : > { %2902 = vst [vmem:[#allocation19_spill] sm:$0xff] %v2018_v56  ;;  %2905 = vst [vmem:[#allocation22_spill] sm:$0xff] %v2026_v12  ;;  %790 = vmax.xlane.f32.xlu1 %v2008_v5  ;;  %838 = vmax.xlane.f32.xlu0 %v2018_v56  ;;  %v851_v0 = vshra.s32 %v2020_v30, 16  ;;  %v723_v59 = vsel %vm691_vm15, %v1673_v26, 4294967295  ;;  %vm696_vm0 = vcmp.eq.s32.totalorder %v1848_v52, %v1679_v29  ;;  %v2039_v32 = vcvt.s32.f32 %v867_v1 }
  0xca   : > { %2904 = vst [vmem:[#allocation21_spill] sm:$0xff] %v2024_v23  ;;  %vm697_vm1 = vcmp.eq.s32.totalorder %v1848_v52, %v1696_v35  ;;  %vm880_vm2 = vcmp.gt.s32.totalorder %v722_v24, %v723_v59  ;;  %v728_v43 = vsel %vm696_vm0, %v1660_v21, 4294967295  ;;  %v899_v63 = vshra.s32 %v2026_v12, 16 }
  0xcb   : > { %2906 = vst [vmem:[#allocation23_spill] sm:$0xff] %v2039_v32  ;;  %v729_v25 = vsel %vm697_vm1, %v1673_v26, 4294967295  ;;  %v2044_v5 = vsel %vm880_vm2, %v722_v24, %v723_v59  ;;  %vm694_vm4 = vcmp.eq.s32.totalorder %v1816_v19, %v1679_v29  ;;  %vm695_vm6 = vcmp.eq.s32.totalorder %v1816_v19, %v1696_v35 }
  0xcc   : > { %2907 = vst [vmem:[#allocation24_spill] sm:$0xff] %v2044_v5  ;;  %vm928_vm3 = vcmp.gt.s32.totalorder %v728_v43, %v729_v25  ;;  %v883_v30 = vshra.s32 %v2044_v5, 16  ;;  %v726_v1 = vsel %vm694_vm4, %v1660_v21, 4294967295  ;;  %v2056_v12 = vcvt.s32.f32 %v851_v0 }
  0xcd   : > { %v2049_v56 = vsel %vm928_vm3, %v728_v43, %v729_v25  ;;  %822 = vmax.xlane.f32.xlu1 %v2024_v23  ;;  %870 = vmax.xlane.f32.xlu0 %v2039_v32  ;;  %v727_v24 = vsel %vm695_vm6, %v1673_v26, 4294967295  ;;  %vm700_vm7 = vcmp.eq.s32.totalorder %v1874_v7, %v1679_v29  ;;  %vm701_vm8 = vcmp.eq.s32.totalorder %v1874_v7, %v1696_v35 }
  0xce   : > { %2908 = vst [vmem:[#allocation25_spill] sm:$0xff] %v2049_v56  ;;  %2909 = vst [vmem:[#allocation26_spill] sm:$0xff] %v2056_v12  ;;  %v931_v59 = vshra.s32 %v2049_v56, 16  ;;  %vm912_vm5 = vcmp.gt.s32.totalorder %v726_v1, %v727_v24  ;;  %v732_v43 = vsel %vm700_vm7, %v1660_v21, 4294967295  ;;  %v733_v25 = vsel %vm701_vm8, %v1673_v26, 4294967295 }
  0xcf   : > { %v2066_v5 = vcvt.s32.f32 %v899_v63  ;;  %v2068_v23 = vsel %vm912_vm5, %v726_v1, %v727_v24  ;;  %vm960_vm9 = vcmp.gt.s32.totalorder %v732_v43, %v733_v25  ;;  %vm698_vm10 = vcmp.eq.s32.totalorder %v1846_v48, %v1679_v29 }
  0xd0   : > { %2911 = vst [vmem:[#allocation28_spill] sm:$0xff] %v2068_v23  ;;  %v2072_v0 = vcvt.s32.f32 %v883_v30  ;;  %v2074_v32 = vsel %vm960_vm9, %v732_v43, %v733_v25  ;;  %vm699_vm11 = vcmp.eq.s32.totalorder %v1846_v48, %v1696_v35  ;;  %v730_v56 = vsel %vm698_vm10, %v1660_v21, 4294967295 }
  0xd1   : > { %2910 = vst [vmem:[#allocation27_spill] sm:$0xff] %v2066_v5  ;;  %854 = vmax.xlane.f32.xlu1 %v2056_v12  ;;  %902 = vmax.xlane.f32.xlu0 %v2066_v5  ;;  %v915_v63 = vshra.s32 %v2068_v23, 16  ;;  %v731_v1 = vsel %vm699_vm11, %v1673_v26, 4294967295  ;;  %vm1052_vm12 = vcmp.eq.s32.totalorder %v1677_v28, %v1698_v36  ;;  %vm1053_vm13 = vcmp.eq.s32.totalorder %v1677_v28, %v1710_v41 }
  0xd2   : > { %v2087_v30 = vcvt.s32.f32 %v931_v59  ;;  %vm944_vm14 = vcmp.gt.s32.totalorder %v730_v56, %v731_v1  ;;  %v1084_v24 = vsel %vm1052_vm12, %v1660_v21, 4294967295  ;;  %v1085_v43 = vsel %vm1053_vm13, %v1673_v26, 4294967295 }
  0xd3   : > { %v963_v25 = vshra.s32 %v2074_v32, 16  ;;  %v2092_v12 = vsel %vm944_vm14, %v730_v56, %v731_v1  ;;  %vm1116_vm15 = vcmp.gt.s32.totalorder %v1084_v24, %v1085_v43  ;;  %vm702_vm0 = vcmp.eq.s32.totalorder %v1882_v15, %v1679_v29 }
  0xd4   : > { %2912 = vst [vmem:[#allocation29_spill] sm:$0xff] %v2092_v12  ;;  %v947_v23 = vshra.s32 %v2092_v12, 16  ;;  %v2097_v5 = vsel %vm1116_vm15, %v1084_v24, %v1085_v43  ;;  %vm703_vm1 = vcmp.eq.s32.totalorder %v1882_v15, %v1696_v35  ;;  %v734_v28 = vsel %vm702_vm0, %v1660_v21, 4294967295 }
  0xd5   : > { %886 = vmax.xlane.f32.xlu1 %v2072_v0  ;;  %934 = vmax.xlane.f32.xlu0 %v2087_v30  ;;  %v2104_v59 = vcvt.s32.f32 %v915_v63  ;;  %v735_v56 = vsel %vm703_vm1, %v1673_v26, 4294967295  ;;  %vm1056_vm2 = vcmp.eq.s32.totalorder %v1675_v27, %v1698_v36  ;;  %vm1057_vm3 = vcmp.eq.s32.totalorder %v1675_v27, %v1710_v41 }
  0xd6   : > { %v1119_v29 = vshra.s32 %v2097_v5, 16  ;;  %vm976_vm4 = vcmp.gt.s32.totalorder %v734_v28, %v735_v56  ;;  %v1088_v35 = vsel %vm1056_vm2, %v1660_v21, 4294967295  ;;  %v1089_v1 = vsel %vm1057_vm3, %v1673_v26, 4294967295 }
  0xd7   : > { %2913 = vst [vmem:[#allocation30_spill] sm:$0xff] %v2104_v59  ;;  %v2114_v24 = vcvt.s32.f32 %v963_v25  ;;  %v2116_v43 = vsel %vm976_vm4, %v734_v28, %v735_v56  ;;  %vm1148_vm6 = vcmp.gt.s32.totalorder %v1088_v35, %v1089_v1  ;;  %vm1054_vm7 = vcmp.eq.s32.totalorder %v1702_v38, %v1698_v36 }
  0xd8   : > { %2914 = vst [vmem:[#allocation31_spill] sm:$0xff] %v2116_v43  ;;  %v2120_v63 = vcvt.s32.f32 %v947_v23  ;;  %v2122_v12 = vsel %vm1148_vm6, %v1088_v35, %v1089_v1  ;;  %vm1055_vm8 = vcmp.eq.s32.totalorder %v1702_v38, %v1710_v41  ;;  %v1086_v27 = vsel %vm1054_vm7, %v1660_v21, 4294967295 }
  0xd9   : > { %918 = vmax.xlane.f32.xlu1 %v2104_v59  ;;  %966 = vmax.xlane.f32.xlu0 %v2114_v24  ;;  %v979_v25 = vshra.s32 %v2116_v43, 16  ;;  %v1087_v28 = vsel %vm1055_vm8, %v1673_v26, 4294967295  ;;  %vm1060_vm5 = vcmp.eq.s32.totalorder %v1731_v50, %v1698_v36  ;;  %vm1061_vm9 = vcmp.eq.s32.totalorder %v1731_v50, %v1710_v41 }
  0xda   : > { %2915 = vst [vmem:[#allocation32_spill] sm:$0xff] %v2120_v63  ;;  %v2135_v23 = vcvt.s32.f32 %v1119_v29  ;;  %vm1132_vm10 = vcmp.gt.s32.totalorder %v1086_v27, %v1087_v28  ;;  %v1092_v38 = vsel %vm1060_vm5, %v1660_v21, 4294967295  ;;  %v1093_v56 = vsel %vm1061_vm9, %v1673_v26, 4294967295 }
  0xdb   : > { %v1151_v35 = vshra.s32 %v2122_v12, 16  ;;  %v2140_v1 = vsel %vm1132_vm10, %v1086_v27, %v1087_v28  ;;  %vm1180_vm11 = vcmp.gt.s32.totalorder %v1092_v38, %v1093_v56  ;;  %vm1058_vm12 = vcmp.eq.s32.totalorder %v1700_v37, %v1698_v36 }
  0xdc   : > { %2916 = vst [vmem:[#allocation33_spill] sm:$0xff] %v2140_v1  ;;  %v2144_v43 = vsel %vm1180_vm11, %v1092_v38, %v1093_v56  ;;  %vm1059_vm13 = vcmp.eq.s32.totalorder %v1700_v37, %v1710_v41  ;;  %v2150_v50 = vcvt.s32.f32 %v979_v25  ;;  %v1135_v29 = vshra.s32 %v2140_v1, 16 }
  0xdd   : > { %950 = vmax.xlane.f32.xlu1 %v2120_v63  ;;  %1122 = vmax.xlane.f32.xlu0 %v2135_v23  ;;  %v1090_v27 = vsel %vm1058_vm12, %v1660_v21, 4294967295  ;;  %v1091_v28 = vsel %vm1059_vm13, %v1673_v26, 4294967295  ;;  %v1183_v59 = vshra.s32 %v2144_v43, 16  ;;  %vm1064_vm15 = vcmp.eq.s32.totalorder %v1762_v61, %v1698_v36 }
  0xde   : > { %2917 = vst [vmem:[#allocation34_spill] sm:$0xff] %v2150_v50  ;;  %vm1164_vm14 = vcmp.gt.s32.totalorder %v1090_v27, %v1091_v28  ;;  %vm1065_vm0 = vcmp.eq.s32.totalorder %v1762_v61, %v1710_v41  ;;  %v2160_v37 = vcvt.s32.f32 %v1151_v35  ;;  %v1096_v25 = vsel %vm1064_vm15, %v1660_v21, 4294967295 }
  0xdf   : > { %v2162_v38 = vsel %vm1164_vm14, %v1090_v27, %v1091_v28  ;;  %v1097_v56 = vsel %vm1065_vm0, %v1673_v26, 4294967295  ;;  %vm1062_vm2 = vcmp.eq.s32.totalorder %v1729_v49, %v1698_v36  ;;  %vm1063_vm3 = vcmp.eq.s32.totalorder %v1729_v49, %v1710_v41 }
  0xe0   : > { %2918 = vst [vmem:[#allocation35_spill] sm:$0xff] %v2162_v38  ;;  %v1167_v1 = vshra.s32 %v2162_v38, 16  ;;  %vm1212_vm1 = vcmp.gt.s32.totalorder %v1096_v25, %v1097_v56  ;;  %v1094_v61 = vsel %vm1062_vm2, %v1660_v21, 4294967295  ;;  %vm1068_vm4 = vcmp.eq.s32.totalorder %v1794_v10, %v1698_v36 }
  0xe1   : > { %982 = vmax.xlane.f32.xlu1 %v2150_v50  ;;  %1154 = vmax.xlane.f32.xlu0 %v2160_v37  ;;  %v2171_v63 = vsel %vm1212_vm1, %v1096_v25, %v1097_v56  ;;  %v2178_v35 = vcvt.s32.f32 %v1135_v29  ;;  %v2180_v27 = vcvt.s32.f32 %v1183_v59  ;;  %v1095_v38 = vsel %vm1063_vm3, %v1673_v26, 4294967295 }
  0xe2   : > { %v1215_v28 = vshra.s32 %v2171_v63, 16  ;;  %vm1196_vm6 = vcmp.gt.s32.totalorder %v1094_v61, %v1095_v38  ;;  %vm1069_vm7 = vcmp.eq.s32.totalorder %v1794_v10, %v1710_v41  ;;  %v1100_v25 = vsel %vm1068_vm4, %v1660_v21, 4294967295 }
  0xe3   : > { %2919 = vst [vmem:[#allocation36_spill] sm:$0xff] %v2178_v35  ;;  %vm1066_vm8 = vcmp.eq.s32.totalorder %v1760_v60, %v1698_v36  ;;  %v2189_v49 = vsel %vm1196_vm6, %v1094_v61, %v1095_v38  ;;  %v1101_v29 = vsel %vm1069_vm7, %v1673_v26, 4294967295  ;;  %vm1067_vm5 = vcmp.eq.s32.totalorder %v1760_v60, %v1710_v41 }
  0xe4   : > { %2920 = vst [vmem:[#allocation37_spill] sm:$0xff] %v2189_v49  ;;  %v2196_v59 = vcvt.s32.f32 %v1167_v1  ;;  %vm1244_vm9 = vcmp.gt.s32.totalorder %v1100_v25, %v1101_v29  ;;  %v1098_v10 = vsel %vm1066_vm8, %v1660_v21, 4294967295  ;;  %v1099_v50 = vsel %vm1067_vm5, %v1673_v26, 4294967295 }
  0xe5   : > { %1138 = vmax.xlane.f32.xlu1 %v2178_v35  ;;  %1186 = vmax.xlane.f32.xlu0 %v2180_v27  ;;  %v2199_v56 = vsel %vm1244_vm9, %v1100_v25, %v1101_v29  ;;  %vm1072_vm10 = vcmp.eq.s32.totalorder %v1818_v20, %v1698_v36  ;;  %vm1073_vm11 = vcmp.eq.s32.totalorder %v1818_v20, %v1710_v41  ;;  %v2206_v60 = vcvt.s32.f32 %v1215_v28 }
  0xe6   : > { %2921 = vst [vmem:[#allocation38_spill] sm:$0xff] %v2196_v59  ;;  %v1199_v38 = vshra.s32 %v2189_v49, 16  ;;  %v1247_v1 = vshra.s32 %v2199_v56, 16  ;;  %vm1228_vm12 = vcmp.gt.s32.totalorder %v1098_v10, %v1099_v50  ;;  %v1104_v25 = vsel %vm1072_vm10, %v1660_v21, 4294967295 }
  0xe7   : > { %v2210_v61 = vsel %vm1228_vm12, %v1098_v10, %v1099_v50  ;;  %v1105_v29 = vsel %vm1073_vm11, %v1673_v26, 4294967295  ;;  %vm1070_vm13 = vcmp.eq.s32.totalorder %v1792_v9, %v1698_v36  ;;  %vm1071_vm15 = vcmp.eq.s32.totalorder %v1792_v9, %v1710_v41 }
  0xe8   : > { %2922 = vst [vmem:[#allocation39_spill] sm:$0xff] %v2210_v61  ;;  %v1231_v20 = vshra.s32 %v2210_v61, 16  ;;  %vm1276_vm14 = vcmp.gt.s32.totalorder %v1104_v25, %v1105_v29  ;;  %v1102_v50 = vsel %vm1070_vm13, %v1660_v21, 4294967295  ;;  %vm1076_vm0 = vcmp.eq.s32.totalorder %v1848_v52, %v1698_v36 }
  0xe9   : > { %1170 = vmax.xlane.f32.xlu1 %v2196_v59  ;;  %1218 = vmax.xlane.f32.xlu0 %v2206_v60  ;;  %v2219_v28 = vsel %vm1276_vm14, %v1104_v25, %v1105_v29  ;;  %v2226_v10 = vcvt.s32.f32 %v1199_v38  ;;  %v2228_v49 = vcvt.s32.f32 %v1247_v1  ;;  %v1103_v35 = vsel %vm1071_vm15, %v1673_v26, 4294967295 }
  0xea   : > { %2923 = vst [vmem:[#allocation40_spill] sm:$0xff] %v2219_v28  ;;  %v1279_v59 = vshra.s32 %v2219_v28, 16  ;;  %vm1260_vm1 = vcmp.gt.s32.totalorder %v1102_v50, %v1103_v35  ;;  %vm1077_vm2 = vcmp.eq.s32.totalorder %v1848_v52, %v1710_v41  ;;  %v1108_v25 = vsel %vm1076_vm0, %v1660_v21, 4294967295 }
  0xeb   : > { %2924 = vst [vmem:[#allocation41_spill] sm:$0xff] %v2226_v10  ;;  %vm1074_vm3 = vcmp.eq.s32.totalorder %v1816_v19, %v1698_v36  ;;  %v2239_v9 = vcvt.s32.f32 %v1231_v20  ;;  %v2241_v38 = vsel %vm1260_vm1, %v1102_v50, %v1103_v35  ;;  %v1109_v1 = vsel %vm1077_vm2, %v1673_v26, 4294967295 }
  0xec   : > { %vm1075_vm4 = vcmp.eq.s32.totalorder %v1816_v19, %v1710_v41  ;;  %v2246_v29 = vcvt.s32.f32 %v1279_v59  ;;  %v1263_v52 = vshra.s32 %v2241_v38, 16  ;;  %vm1308_vm6 = vcmp.gt.s32.totalorder %v1108_v25, %v1109_v1 }
  0xed   : > { %1202 = vmax.xlane.f32.xlu1 %v2226_v10  ;;  %1250 = vmax.xlane.f32.xlu0 %v2228_v49  ;;  %v1106_v61 = vsel %vm1074_vm3, %v1660_v21, 4294967295  ;;  %v2250_v28 = vsel %vm1308_vm6, %v1108_v25, %v1109_v1  ;;  %v1107_v10 = vsel %vm1075_vm4, %v1673_v26, 4294967295  ;;  %vm1080_vm7 = vcmp.eq.s32.totalorder %v1874_v7, %v1698_v36 }
  0xee   : > { %vm1081_vm8 = vcmp.eq.s32.totalorder %v1874_v7, %v1710_v41  ;;  %v1311_v35 = vshra.s32 %v2250_v28, 16  ;;  %vm1292_vm5 = vcmp.gt.s32.totalorder %v1106_v61, %v1107_v10  ;;  %v1112_v59 = vsel %vm1080_vm7, %v1660_v21, 4294967295 }
  0xef   : > { %v2260_v19 = vsel %vm1292_vm5, %v1106_v61, %v1107_v10  ;;  %v1113_v20 = vsel %vm1081_vm8, %v1673_v26, 4294967295  ;;  %vm1078_vm9 = vcmp.eq.s32.totalorder %v1846_v48, %v1698_v36  ;;  %v2266_v50 = vcvt.s32.f32 %v1263_v52 }
  0xf0   : > { %2925 = vst [vmem:[#allocation42_spill] sm:$0xff] %v2260_v19  ;;  %v2268_v25 = vcvt.s32.f32 %v1311_v35  ;;  %v1295_v7 = vshra.s32 %v2260_v19, 16  ;;  %vm1340_vm10 = vcmp.gt.s32.totalorder %v1112_v59, %v1113_v20  ;;  %vm1079_vm11 = vcmp.eq.s32.totalorder %v1846_v48, %v1710_v41 }
  0xf1   : > { %1234 = vmax.xlane.f32.xlu1 %v2239_v9  ;;  %1282 = vmax.xlane.f32.xlu0 %v2246_v29  ;;  %2926 = vst [vmem:[#allocation43_spill] sm:$0xff] %v2266_v50  ;;  %v2271_v1 = vsel %vm1340_vm10, %v1112_v59, %v1113_v20  ;;  %v1110_v61 = vsel %vm1078_vm9, %v1660_v21, 4294967295  ;;  %vm1082_vm12 = vcmp.eq.s32.totalorder %v1882_v15, %v1698_v36  ;;  %v1111_v52 = vsel %vm1079_vm11, %v1673_v26, 4294967295 }
  0xf2   : > { %v1343_v10 = vshra.s32 %v2271_v1, 16  ;;  %vm1324_vm13 = vcmp.gt.s32.totalorder %v1110_v61, %v1111_v52  ;;  %vm1083_vm14 = vcmp.eq.s32.totalorder %v1882_v15, %v1710_v41  ;;  %v1114_v35 = vsel %vm1082_vm12, %v1660_v21, 4294967295 }
  0xf3   : > { %v2285_v48 = vsel %vm1324_vm13, %v1110_v61, %v1111_v52  ;;  %v1115_v59 = vsel %vm1083_vm14, %v1673_v26, 4294967295  ;;  %v2288_v20 = vcvt.s32.f32 %v1295_v7  ;;  %vm182_vm0 = vcmask 7168  }
  0xf4   : > { %v2290_v36 = vcvt.s32.f32 %v1343_v10  ;;  %v1327_v19 = vshra.s32 %v2285_v48, 16  ;;  %vm1356_vm15 = vcmp.gt.s32.totalorder %v1114_v35, %v1115_v59  ;;  %v1618_v15 = vmov 4294967295  }
  0xf5   : > { %1266 = vmax.xlane.f32.xlu1 %v2266_v50  ;;  %1314 = vmax.xlane.f32.xlu0 %v2268_v25  ;;  %v2293_v50 = vsel %vm1356_vm15, %v1114_v35, %v1115_v59  ;;  %183 = vst.msk [vmem:[#allocation2] sm:$0xff] %vm182_vm0, %v1618_v15  ;;  %184 = vst.msk [vmem:[#allocation2 + $0x8] sm:$0xff] %vm182_vm0, %v1618_v15  ;;  %v374_v35 = vand.u32 65535, %v1749_v55  ;;  %v406_v55 = vand.u32 65535, %v1733_v51  ;;  %v518_v51 = vand.u32 65535, %v1852_v54 }
  0xf6   : > { %2927 = vst [vmem:[#allocation44_spill] sm:$0xff] %v2293_v50  ;;  %v2297_v41 = vcvt.s32.f32 %v1327_v19  ;;  %v1359_v21 = vshra.s32 %v2293_v50, 16  ;;  %185 = vst.msk [vmem:[#allocation2 + $0x10] sm:$0xff] %vm182_vm0, %v1618_v15  ;;  %v358_v19 = vand.u32 65535, %v1706_v40  ;;  %v550_v54 = vand.u32 65535, %v1876_v8 }
  0xf7   : > { %186 = vst.msk [vmem:[#allocation2 + $0x18] sm:$0xff] %vm182_vm0, %v1618_v15  ;;  %187 = vst.msk [vmem:[#allocation2 + $0x20] sm:$0xff] %vm182_vm0, %v1618_v15  ;;  %v582_v8 = vand.u32 65535, %v1903_v57  ;;  %v738_v57 = vand.u32 65535, %v1825_v31  ;;  %v770_v31 = vand.u32 65535, %v1930_v17 }
  0xf8   : > { %v2301_v26 = vcvt.s32.f32 %v1359_v21  ;;  %188 = vst.msk [vmem:[#allocation2 + $0x28] sm:$0xff] %vm182_vm0, %v1618_v15  ;;  %189 = vst.msk [vmem:[#allocation2 + $0x30] sm:$0xff] %vm182_vm0, %v1618_v15  ;;  %v360_v10 = vcvt.s32.f32 %v358_v19 }
  0xf9   : > { %1298 = vmax.xlane.f32.xlu1 %v2288_v20  ;;  %1346 = vmax.xlane.f32.xlu0 %v2290_v36  ;;  %190 = vst.msk [vmem:[#allocation2 + $0x38] sm:$0xff] %vm182_vm0, %v1618_v15  ;;  %191 = vst.msk [vmem:[#allocation2 + $0x40] sm:$0xff] %vm182_vm0, %v1618_v15 }
  0xfa   : > { %2928 = vst [vmem:[#allocation45_spill] sm:$0xff] %v2301_v26  ;;  %192 = vst.msk [vmem:[#allocation2 + $0x48] sm:$0xff] %vm182_vm0, %v1618_v15 }
  0xfb   : > { %193 = vst.msk [vmem:[#allocation2 + $0x50] sm:$0xff] %vm182_vm0, %v1618_v15  ;;  %194 = vst.msk [vmem:[#allocation2 + $0x58] sm:$0xff] %vm182_vm0, %v1618_v15 }
  0xfc   : > { %195 = vst.msk [vmem:[#allocation2 + $0x60] sm:$0xff] %vm182_vm0, %v1618_v15  ;;  %196 = vst.msk [vmem:[#allocation2 + $0x68] sm:$0xff] %vm182_vm0, %v1618_v15 }
  0xfd   : > { %1330 = vmax.xlane.f32.xlu1 %v2297_v41  ;;  %197 = vst.msk [vmem:[#allocation2 + $0x70] sm:$0xff] %vm182_vm0, %v1618_v15  ;;  %198 = vst.msk [vmem:[#allocation2 + $0x78] sm:$0xff] %vm182_vm0, %v1618_v15  ;;  %v390_v15 = vand.u32 65535, %v1704_v39  ;;  %v408_v39 = vcvt.s32.f32 %v406_v55 }
 0x101   : > { %1362 = vmax.xlane.f32.xlu1 %v2301_v26  ;;  %v376_v26 = vcvt.s32.f32 %v374_v35 }
 0x12a   : > { %v2321_v7 = vpop.xlane.xlu1 %394  ;;  %v2323_v61 = vpop.xlane.xlu0 %362 }
 0x12b   : > { %vm364_vm1 = vcmp.eq.f32.partialorder %v1726_v47, %v2323_v61  ;;  %vm396_vm3 = vcmp.eq.f32.partialorder %v1724_v46, %v2321_v7  ;;  %v392_v47 = vcvt.s32.f32 %v390_v15  ;;  %v438_v15 = vand.u32 65535, %v1778_v4 }
 0x12c   : > { %v365_v52 = vsel %vm364_vm1, %v360_v10, -inf  ;;  %v454_v4 = vand.u32 65535, %v1801_v14  ;;  %v470_v14 = vand.u32 65535, %v1810_v18  ;;  %v502_v18 = vand.u32 65535, %v1840_v45 }
 0x12d   : > { %366 = vmax.xlane.f32.xlu1 %v365_v52  ;;  %v397_v19 = vsel %vm396_vm3, %v392_v47, -inf  ;;  %v486_v52 = vand.u32 65535, %v1820_v22 }
 0x12e   : > { %v2328_v59 = vpop.xlane.xlu1 %410 }
 0x12f   : > { %vm412_vm4 = vcmp.eq.f32.partialorder %v1755_v58, %v2328_v59  ;;  %v488_v46 = vcvt.s32.f32 %v486_v52 }
 0x130   : > { %v2330_v21 = vpop.xlane.xlu0 %378 }
 0x131   : > { %vm380_vm2 = vcmp.eq.f32.partialorder %v1773_v2, %v2330_v21  ;;  %v422_v2 = vand.u32 65535, %v1764_v62 }
 0x132   : > { %v381_v40 = vsel %vm380_vm2, %v376_v26, -inf  ;;  %v2335_v50 = vpop.xlane.xlu1 %426  ;;  %v413_v26 = vsel %vm412_vm4, %v408_v39, -inf }
 0x133   : > { %382 = vmax.xlane.f32.xlu0 %v381_v40  ;;  %vm428_vm6 = vcmp.eq.f32.partialorder %v1786_v6, %v2335_v50  ;;  %v424_v22 = vcvt.s32.f32 %v422_v2  ;;  %v440_v6 = vcvt.s32.f32 %v438_v15 }
 0x135   : > { %v429_v62 = vsel %vm428_vm6, %v424_v22, -inf }
 0x136   : > { %v2340_v10 = vpop.xlane.xlu1 %442 }
 0x137   : > { %398 = vmax.xlane.f32.xlu0 %v397_v19  ;;  %v520_v19 = vcvt.s32.f32 %v518_v51  ;;  %vm444_vm8 = vcmp.eq.f32.partialorder %v1799_v13, %v2340_v10  ;;  %v456_v13 = vcvt.s32.f32 %v454_v4 }
 0x138   : > { %v445_v52 = vsel %vm444_vm8, %v440_v6, -inf  ;;  %v2929_v6 = vld [vmem:[#allocation3_spill] sm:$0xff] }
 0x139   : > { %v534_v45 = vand.u32 65535, %v2929_v6  ;;  %v2937_v6 = vld [vmem:[#allocation6_spill] sm:$0xff] }
 0x13a   : > { %v2346_v35 = vpop.xlane.xlu1 %458  ;;  %v2348_v40 = vpop.xlane.xlu0 %490 }
 0x13b   : > { %414 = vmax.xlane.f32.xlu0 %v413_v26  ;;  %vm492_vm7 = vcmp.eq.f32.partialorder %v1838_v44, %v2348_v40  ;;  %v552_v26 = vcvt.s32.f32 %v550_v54  ;;  %vm460_vm9 = vcmp.eq.f32.partialorder %v1834_v34, %v2346_v35  ;;  %v472_v34 = vcvt.s32.f32 %v470_v14  ;;  %v2933_v14 = vld [vmem:[#allocation4_spill] sm:$0xff] }
 0x13c   : > { %v493_v58 = vsel %vm492_vm7, %v488_v46, -inf  ;;  %v461_v46 = vsel %vm460_vm9, %v456_v13, -inf  ;;  %v740_v54 = vcvt.s32.f32 %v738_v57  ;;  %v2931_v13 = vld [vmem:[#allocation5_spill] sm:$0xff] }
 0x13d   : > { %494 = vmax.xlane.f32.xlu1 %v493_v58  ;;  %v584_v58 = vcvt.s32.f32 %v582_v8  ;;  %v2930_v8 = vld [vmem:[#allocation9_spill] sm:$0xff] }
 0x13e   : > { %v2356_v47 = vpop.xlane.xlu1 %474  ;;  %v2358_v55 = vpop.xlane.xlu0 %522  ;;  %v802_v17 = vand.u32 65535, %v2930_v8 }
 0x13f   : > { %430 = vmax.xlane.f32.xlu0 %v429_v62  ;;  %vm524_vm5 = vcmp.eq.f32.partialorder %v1868_v3, %v2358_v55  ;;  %vm476_vm11 = vcmp.eq.f32.partialorder %v1850_v53, %v2356_v47  ;;  %v504_v53 = vcvt.s32.f32 %v502_v18  ;;  %v2934_v18 = vld [vmem:[#allocation14_spill] sm:$0xff] }
 0x140   : > { %v525_v44 = vsel %vm524_vm5, %v520_v19, -inf  ;;  %v477_v15 = vsel %vm476_vm11, %v472_v34, -inf }
 0x141   : > { %526 = vmax.xlane.f32.xlu1 %v525_v44 }
 0x142   : > { %v2366_v39 = vpop.xlane.xlu1 %506  ;;  %v2368_v2 = vpop.xlane.xlu0 %554 }
 0x143   : > { %446 = vmax.xlane.f32.xlu0 %v445_v52  ;;  %vm556_vm10 = vcmp.eq.f32.partialorder %v1897_v42, %v2368_v2  ;;  %vm508_vm13 = vcmp.eq.f32.partialorder %v1895_v33, %v2366_v39  ;;  %v2932_v33 = vld [vmem:[#allocation11_spill] sm:$0xff] }
 0x144   : > { %v557_v3 = vsel %vm556_vm10, %v552_v26, -inf  ;;  %v509_v44 = vsel %vm508_vm13, %v504_v53, -inf  ;;  %v772_v26 = vcvt.s32.f32 %v770_v31  ;;  %v2936_v31 = vld [vmem:[#allocation15_spill] sm:$0xff] }
 0x145   : > { %558 = vmax.xlane.f32.xlu1 %v557_v3 }
 0x146   : > { %v2376_v51 = vpop.xlane.xlu1 %538  ;;  %v2378_v22 = vpop.xlane.xlu0 %586 }
 0x147   : > { %462 = vmax.xlane.f32.xlu0 %v461_v46  ;;  %vm588_vm12 = vcmp.eq.f32.partialorder %v1922_v11, %v2378_v22  ;;  %vm540_vm15 = vcmp.eq.f32.partialorder %v2931_v13, %v2376_v51  ;;  %v566_v46 = vand.u32 65535, %v2933_v14  ;;  %v2938_v13 = vld [vmem:[#allocation17_spill] sm:$0xff] }
 0x148   : > { %v589_v42 = vsel %vm588_vm12, %v584_v58, -inf }
 0x149   : > { %590 = vmax.xlane.f32.xlu1 %v589_v42  ;;  %v804_v42 = vcvt.s32.f32 %v802_v17  ;;  %v568_v53 = vcvt.s32.f32 %v566_v46 }
 0x14a   : > { %v2386_v62 = vpop.xlane.xlu1 %570  ;;  %v2388_v19 = vpop.xlane.xlu0 %742 }
 0x14b   : > { %478 = vmax.xlane.f32.xlu0 %v477_v15  ;;  %vm744_vm14 = vcmp.eq.f32.partialorder %v1928_v16, %v2388_v19  ;;  %v536_v16 = vcvt.s32.f32 %v534_v45  ;;  %v834_v15 = vand.u32 65535, %v2934_v18  ;;  %v598_v45 = vand.u32 65535, %v2937_v6  ;;  %v2944_v6 = vld [vmem:[#allocation13_spill] sm:$0xff] }
 0x14c   : > { %v745_v11 = vsel %vm744_vm14, %v740_v54, -inf  ;;  %v2935_v54 = vld [vmem:[#allocation7_spill] sm:$0xff] }
 0x14d   : > { %746 = vmax.xlane.f32.xlu1 %v745_v11  ;;  %v541_v58 = vsel %vm540_vm15, %v536_v16, -inf  ;;  %vm572_vm2 = vcmp.eq.f32.partialorder %v2935_v54, %v2386_v62  ;;  %v836_v17 = vcvt.s32.f32 %v834_v15  ;;  %v2939_v16 = vld [vmem:[#allocation10_spill] sm:$0xff]  ;;  %v600_v14 = vcvt.s32.f32 %v598_v45 }
 0x14e   : > { %v2396_v4 = vpop.xlane.xlu1 %602  ;;  %v2398_v52 = vpop.xlane.xlu0 %774 }
 0x14f   : > { %510 = vmax.xlane.f32.xlu0 %v509_v44  ;;  %vm776_vm1 = vcmp.eq.f32.partialorder %v2932_v33, %v2398_v52  ;;  %v573_v44 = vsel %vm572_vm2, %v568_v53, -inf  ;;  %v866_v33 = vand.u32 65535, %v2938_v13  ;;  %vm604_vm4 = vcmp.eq.f32.partialorder %v2939_v16, %v2396_v4  ;;  %v2943_v53 = vld [vmem:[#allocation22_spill] sm:$0xff]  ;;  %v2946_v13 = vld [vmem:[#allocation12_spill] sm:$0xff] }
 0x150   : > { %v777_v3 = vsel %vm776_vm1, %v772_v26, -inf  ;;  %v605_v18 = vsel %vm604_vm4, %v600_v14, -inf  ;;  %v786_v16 = vand.u32 65535, %v2946_v13 }
 0x151   : > { %778 = vmax.xlane.f32.xlu1 %v777_v3  ;;  %v2940_v3 = vld [vmem:[#allocation19_spill] sm:$0xff]  ;;  %v868_v15 = vcvt.s32.f32 %v866_v33 }
 0x152   : > { %v2406_v57 = vpop.xlane.xlu1 %758  ;;  %v2408_v34 = vpop.xlane.xlu0 %806 }
 0x153   : > { %542 = vmax.xlane.f32.xlu0 %v541_v58  ;;  %vm808_vm3 = vcmp.eq.f32.partialorder %v2936_v31, %v2408_v34  ;;  %v2941_v58 = vld [vmem:[#allocation8_spill] sm:$0xff]  ;;  %vm760_vm7 = vcmp.eq.f32.partialorder %v2944_v6, %v2406_v57  ;;  %v2949_v6 = vld [vmem:[#allocation27_spill] sm:$0xff] }
 0x154   : > { %v809_v11 = vsel %vm808_vm3, %v804_v42, -inf  ;;  %v754_v42 = vand.u32 65535, %v2941_v58  ;;  %v2947_v58 = vld [vmem:[#allocation25_spill] sm:$0xff] }
 0x155   : > { %810 = vmax.xlane.f32.xlu1 %v809_v11  ;;  %v898_v11 = vand.u32 65535, %v2943_v53  ;;  %v930_v53 = vand.u32 65535, %v2947_v58  ;;  %v962_v58 = vand.u32 65535, %v2074_v32  ;;  %v1118_v32 = vand.u32 65535, %v2097_v5 }
 0x156   : > { %v2416_v26 = vpop.xlane.xlu1 %790  ;;  %v2418_v8 = vpop.xlane.xlu0 %838  ;;  %v756_v45 = vcvt.s32.f32 %v754_v42  ;;  %v788_v42 = vcvt.s32.f32 %v786_v16  ;;  %v1150_v5 = vand.u32 65535, %v2122_v12 }
 0x157   : > { %574 = vmax.xlane.f32.xlu0 %v573_v44  ;;  %vm840_vm6 = vcmp.eq.f32.partialorder %v2940_v3, %v2418_v8  ;;  %v2945_v44 = vld [vmem:[#allocation23_spill] sm:$0xff]  ;;  %v900_v33 = vcvt.s32.f32 %v898_v11  ;;  %v932_v11 = vcvt.s32.f32 %v930_v53  ;;  %v964_v53 = vcvt.s32.f32 %v962_v58 }
 0x158   : > { %v841_v46 = vsel %vm840_vm6, %v836_v17, -inf  ;;  %v761_v3 = vsel %vm760_vm7, %v756_v45, -inf  ;;  %v1120_v58 = vcvt.s32.f32 %v1118_v32  ;;  %v1152_v12 = vcvt.s32.f32 %v1150_v5 }
 0x159   : > { %842 = vmax.xlane.f32.xlu1 %v841_v46 }
 0x15a   : > { %v2426_v54 = vpop.xlane.xlu1 %822  ;;  %v2428_v31 = vpop.xlane.xlu0 %870 }
 0x15b   : > { %2942 = vst [vmem:[#allocation3_spill] sm:$0xff] %v2428_v31  ;;  %606 = vmax.xlane.f32.xlu0 %v605_v18  ;;  %vm872_vm8 = vcmp.eq.f32.partialorder %v2945_v44, %v2428_v31  ;;  %v2948_v18 = vld [vmem:[#allocation18_spill] sm:$0xff]  ;;  %v2950_v44 = vld [vmem:[#allocation16_spill] sm:$0xff] }
 0x15c   : > { %v873_v17 = vsel %vm872_vm8, %v868_v15, -inf  ;;  %vm792_vm5 = vcmp.eq.f32.partialorder %v2948_v18, %v2416_v26  ;;  %v818_v13 = vand.u32 65535, %v2950_v44  ;;  %v2952_v18 = vld [vmem:[#allocation20_spill] sm:$0xff] }
 0x15d   : > { %874 = vmax.xlane.f32.xlu1 %v873_v17  ;;  %v793_v45 = vsel %vm792_vm5, %v788_v42, -inf }
 0x15e   : > { %v2436_v14 = vpop.xlane.xlu1 %854  ;;  %v2438_v46 = vpop.xlane.xlu0 %902  ;;  %v820_v16 = vcvt.s32.f32 %v818_v13 }
 0x15f   : > { %762 = vmax.xlane.f32.xlu0 %v761_v3  ;;  %vm904_vm9 = vcmp.eq.f32.partialorder %v2949_v6, %v2438_v46  ;;  %v2951_v3 = vld [vmem:[#allocation21_spill] sm:$0xff]  ;;  %v850_v6 = vand.u32 65535, %v2952_v18 }
 0x160   : > { %v905_v15 = vsel %vm904_vm9, %v900_v33, -inf  ;;  %vm824_vm10 = vcmp.eq.f32.partialorder %v2951_v3, %v2426_v54 }
 0x161   : > { %906 = vmax.xlane.f32.xlu1 %v905_v15  ;;  %v825_v42 = vsel %vm824_vm10, %v820_v16, -inf }
 0x162   : > { %v2446_v17 = vpop.xlane.xlu1 %886  ;;  %v2448_v31 = vpop.xlane.xlu0 %934 }
 0x163   : > { %794 = vmax.xlane.f32.xlu0 %v793_v45  ;;  %vm936_vm11 = vcmp.eq.f32.partialorder %v2087_v30, %v2448_v31  ;;  %v2953_v45 = vld [vmem:[#allocation26_spill] sm:$0xff]  ;;  %v852_v30 = vcvt.s32.f32 %v850_v6  ;;  %vm888_vm14 = vcmp.eq.f32.partialorder %v2072_v0, %v2446_v17 }
 0x164   : > { %v937_v33 = vsel %vm936_vm11, %v932_v11, -inf  ;;  %vm856_vm12 = vcmp.eq.f32.partialorder %v2953_v45, %v2436_v14  ;;  %v2954_v11 = vld [vmem:[#allocation24_spill] sm:$0xff]  ;;  %v1182_v45 = vand.u32 65535, %v2144_v43  ;;  %v1214_v43 = vand.u32 65535, %v2171_v63 }
 0x165   : > { %938 = vmax.xlane.f32.xlu1 %v937_v33  ;;  %v882_v3 = vand.u32 65535, %v2954_v11  ;;  %v857_v16 = vsel %vm856_vm12, %v852_v30, -inf  ;;  %v2957_v11 = vld [vmem:[#allocation30_spill] sm:$0xff]  ;;  %v1246_v63 = vand.u32 65535, %v2199_v56 }
 0x166   : > { %v2456_v15 = vpop.xlane.xlu1 %918  ;;  %v2458_v44 = vpop.xlane.xlu0 %966  ;;  %v1184_v5 = vcvt.s32.f32 %v1182_v45  ;;  %v1216_v45 = vcvt.s32.f32 %v1214_v43 }
 0x167   : > { %826 = vmax.xlane.f32.xlu0 %v825_v42  ;;  %vm968_vm13 = vcmp.eq.f32.partialorder %v2114_v24, %v2458_v44  ;;  %v884_v24 = vcvt.s32.f32 %v882_v3  ;;  %v2955_v42 = vld [vmem:[#allocation28_spill] sm:$0xff]  ;;  %vm920_vm1 = vcmp.eq.f32.partialorder %v2957_v11, %v2456_v15  ;;  %v2958_v3 = vld [vmem:[#allocation29_spill] sm:$0xff]  ;;  %v1248_v43 = vcvt.s32.f32 %v1246_v63 }
 0x168   : > { %v969_v13 = vsel %vm968_vm13, %v964_v53, -inf  ;;  %v914_v53 = vand.u32 65535, %v2955_v42  ;;  %v2959_v42 = vld [vmem:[#allocation32_spill] sm:$0xff] }
 0x169   : > { %970 = vmax.xlane.f32.xlu1 %v969_v13  ;;  %v889_v30 = vsel %vm888_vm14, %v884_v24, -inf }
 0x16a   : > { %v2466_v33 = vpop.xlane.xlu1 %950  ;;  %v2468_v18 = vpop.xlane.xlu0 %1122  ;;  %v916_v0 = vcvt.s32.f32 %v914_v53 }
 0x16b   : > { %858 = vmax.xlane.f32.xlu0 %v857_v16  ;;  %vm1124_vm15 = vcmp.eq.f32.partialorder %v2135_v23, %v2468_v18  ;;  %v946_v16 = vand.u32 65535, %v2958_v3  ;;  %vm952_vm4 = vcmp.eq.f32.partialorder %v2959_v42, %v2466_v33  ;;  %v2962_v3 = vld [vmem:[#allocation33_spill] sm:$0xff]  ;;  %v2963_v42 = vld [vmem:[#allocation40_spill] sm:$0xff] }
 0x16c   : > { %v1125_v6 = vsel %vm1124_vm15, %v1120_v58, -inf  ;;  %v921_v58 = vsel %vm920_vm1, %v916_v0, -inf  ;;  %v1278_v56 = vand.u32 65535, %v2963_v42 }
 0x16d   : > { %1126 = vmax.xlane.f32.xlu1 %v1125_v6 }
 0x16e   : > { %v2477_v13 = vpop.xlane.xlu1 %982  ;;  %v2479_v32 = vpop.xlane.xlu0 %1154  ;;  %v1280_v63 = vcvt.s32.f32 %v1278_v56 }
 0x16f   : > { %2956 = vst [vmem:[#allocation9_spill] sm:$0xff] %v2477_v13  ;;  %890 = vmax.xlane.f32.xlu0 %v889_v30  ;;  %vm1156_vm2 = vcmp.eq.f32.partialorder %v2160_v37, %v2479_v32  ;;  %v948_v37 = vcvt.s32.f32 %v946_v16  ;;  %v2960_v30 = vld [vmem:[#allocation31_spill] sm:$0xff]  ;;  %v1134_v16 = vand.u32 65535, %v2962_v3  ;;  %v1310_v3 = vand.u32 65535, %v2250_v28 }
 0x170   : > { %v1157_v23 = vsel %vm1156_vm2, %v1152_v12, -inf  ;;  %v978_v12 = vand.u32 65535, %v2960_v30  ;;  %v1342_v28 = vand.u32 65535, %v2271_v1 }
 0x171   : > { %1158 = vmax.xlane.f32.xlu1 %v1157_v23  ;;  %v953_v11 = vsel %vm952_vm4, %v948_v37, -inf  ;;  %v1312_v56 = vcvt.s32.f32 %v1310_v3  ;;  %v1262_v3 = vand.u32 65535, %v2241_v38  ;;  %v1326_v38 = vand.u32 65535, %v2285_v48 }
 0x172   : > { %v2487_v24 = vpop.xlane.xlu1 %1138  ;;  %v2489_v6 = vpop.xlane.xlu0 %1186  ;;  %v385_v48 = vcvt.f32.s32 %v2330_v21  ;;  %v449_v21 = vcvt.f32.s32 %v2340_v10 }
 0x173   : > { %922 = vmax.xlane.f32.xlu0 %v921_v58  ;;  %vm1188_vm3 = vcmp.eq.f32.partialorder %v2180_v27, %v2489_v6  ;;  %v2961_v27 = vld [vmem:[#allocation34_spill] sm:$0xff]  ;;  %v980_v58 = vcvt.s32.f32 %v978_v12  ;;  %v1136_v12 = vcvt.s32.f32 %v1134_v16 }
 0x174   : > { %v1189_v53 = vsel %vm1188_vm3, %v1184_v5, -inf  ;;  %vm984_vm7 = vcmp.eq.f32.partialorder %v2961_v27, %v2477_v13  ;;  %v2967_v13 = vld [vmem:[#allocation38_spill] sm:$0xff] }
 0x175   : > { %1190 = vmax.xlane.f32.xlu1 %v1189_v53  ;;  %v985_v37 = vsel %vm984_vm7, %v980_v58, -inf }
 0x176   : > { %v2497_v0 = vpop.xlane.xlu1 %1170  ;;  %v2499_v23 = vpop.xlane.xlu0 %1218 }
 0x177   : > { %954 = vmax.xlane.f32.xlu0 %v953_v11  ;;  %vm1220_vm6 = vcmp.eq.f32.partialorder %v2206_v60, %v2499_v23  ;;  %v2964_v11 = vld [vmem:[#allocation36_spill] sm:$0xff]  ;;  %v2965_v60 = vld [vmem:[#allocation35_spill] sm:$0xff]  ;;  %vm1172_vm9 = vcmp.eq.f32.partialorder %v2967_v13, %v2497_v0 }
 0x178   : > { %v1221_v5 = vsel %vm1220_vm6, %v1216_v45, -inf  ;;  %vm1140_vm8 = vcmp.eq.f32.partialorder %v2964_v11, %v2487_v24  ;;  %v1166_v27 = vand.u32 65535, %v2965_v60 }
 0x179   : > { %1222 = vmax.xlane.f32.xlu1 %v1221_v5  ;;  %v1141_v58 = vsel %vm1140_vm8, %v1136_v12, -inf }
 0x17a   : > { %v2507_v53 = vpop.xlane.xlu1 %1202  ;;  %v2509_v30 = vpop.xlane.xlu0 %1250  ;;  %v1168_v16 = vcvt.s32.f32 %v1166_v27 }
 0x17b   : > { %986 = vmax.xlane.f32.xlu0 %v985_v37  ;;  %vm1252_vm5 = vcmp.eq.f32.partialorder %v2228_v49, %v2509_v30  ;;  %v2968_v49 = vld [vmem:[#allocation37_spill] sm:$0xff] }
 0x17c   : > { %v1253_v45 = vsel %vm1252_vm5, %v1248_v43, -inf  ;;  %v1198_v37 = vand.u32 65535, %v2968_v49  ;;  %v1173_v11 = vsel %vm1172_vm9, %v1168_v16, -inf  ;;  %v1344_v49 = vcvt.s32.f32 %v1342_v28  ;;  %v2975_v28 = vld [vmem:[#allocation42_spill] sm:$0xff] }
 0x17d   : > { %1254 = vmax.xlane.f32.xlu1 %v1253_v45  ;;  %v2970_v45 = vld [vmem:[#allocation41_spill] sm:$0xff] }
 0x17e   : > { %v2517_v5 = vpop.xlane.xlu1 %1234  ;;  %v2519_v42 = vpop.xlane.xlu0 %1282  ;;  %vm1204_vm11 = vcmp.eq.f32.partialorder %v2970_v45, %v2507_v53  ;;  %v1200_v27 = vcvt.s32.f32 %v1198_v37  ;;  %v1264_v45 = vcvt.s32.f32 %v1262_v3 }
 0x17f   : > { %2966 = vst [vmem:[#allocation5_spill] sm:$0xff] %v2517_v5  ;;  %1142 = vmax.xlane.f32.xlu0 %v1141_v58  ;;  %vm1284_vm10 = vcmp.eq.f32.partialorder %v2246_v29, %v2519_v42  ;;  %v2971_v29 = vld [vmem:[#allocation39_spill] sm:$0xff]  ;;  %vm1236_vm13 = vcmp.eq.f32.partialorder %v2239_v9, %v2517_v5 }
 0x180   : > { %v1285_v43 = vsel %vm1284_vm10, %v1280_v63, -inf  ;;  %v1230_v13 = vand.u32 65535, %v2971_v29  ;;  %v1205_v63 = vsel %vm1204_vm11, %v1200_v27, -inf  ;;  %v2977_v27 = vld [vmem:[#allocation44_spill] sm:$0xff] }
 0x181   : > { %1286 = vmax.xlane.f32.xlu1 %v1285_v43 }
 0x182   : > { %v2527_v60 = vpop.xlane.xlu1 %1266  ;;  %v2529_v12 = vpop.xlane.xlu0 %1314 }
 0x183   : > { %2969 = vst [vmem:[#allocation11_spill] sm:$0xff] %v2527_v60  ;;  %1174 = vmax.xlane.f32.xlu0 %v1173_v11  ;;  %vm1316_vm12 = vcmp.eq.f32.partialorder %v2268_v25, %v2529_v12  ;;  %v1232_v25 = vcvt.s32.f32 %v1230_v13  ;;  %v2974_v11 = vld [vmem:[#allocation43_spill] sm:$0xff] }
 0x184   : > { %v1317_v58 = vsel %vm1316_vm12, %v1312_v56, -inf  ;;  %vm1268_vm15 = vcmp.eq.f32.partialorder %v2974_v11, %v2527_v60  ;;  %v1294_v56 = vand.u32 65535, %v2975_v28  ;;  %v386_v11 = vshll.u32 %v385_v48, 16 }
 0x185   : > { %1318 = vmax.xlane.f32.xlu1 %v1317_v58  ;;  %v1237_v37 = vsel %vm1236_vm13, %v1232_v25, -inf  ;;  %v1269_v29 = vsel %vm1268_vm15, %v1264_v45, -inf  ;;  %v1358_v58 = vand.u32 65535, %v2977_v27  ;;  %v2979_v25 = vld [vmem:[#allocation45_spill] sm:$0xff]  ;;  %v417_v45 = vcvt.f32.s32 %v2328_v59 }
 0x186   : > { %v2536_v1 = vpop.xlane.xlu0 %1346  ;;  %v2543_v16 = vpop.xlane.xlu1 %1298  ;;  %v401_v48 = vcvt.f32.s32 %v2321_v7  ;;  %v369_v59 = vcvt.f32.s32 %v2323_v61  ;;  %v529_v61 = vcvt.f32.s32 %v2358_v55  ;;  %v577_v55 = vcvt.f32.s32 %v2386_v62 }
 0x187   : > { %2972 = vst [vmem:[#allocation4_spill] sm:$0xff] %v2536_v1  ;;  %1206 = vmax.xlane.f32.xlu0 %v1205_v63  ;;  %vm1348_vm14 = vcmp.eq.f32.partialorder %v2290_v36, %v2536_v1  ;;  %2973 = vst [vmem:[#allocation14_spill] sm:$0xff] %v2543_v16  ;;  %vm1300_vm1 = vcmp.eq.f32.partialorder %v2288_v20, %v2543_v16  ;;  %v1296_v36 = vcvt.s32.f32 %v1294_v56  ;;  %v1360_v20 = vcvt.s32.f32 %v1358_v58 }
 0x188   : > { %v1349_v43 = vsel %vm1348_vm14, %v1344_v49, -inf  ;;  %v1328_v49 = vcvt.s32.f32 %v1326_v38  ;;  %v2598_v16 = vshll.u32 %v529_v61, 16 }
 0x189   : > { %1350 = vmax.xlane.f32.xlu1 %v1349_v43  ;;  %v1301_v13 = vsel %vm1300_vm1, %v1296_v36, -inf  ;;  %v418_v36 = vshll.u32 %v417_v45, 16  ;;  %v497_v45 = vcvt.f32.s32 %v2348_v40  ;;  %v749_v40 = vcvt.f32.s32 %v2388_v19 }
 0x18a   : > { %v2548_v9 = vpop.xlane.xlu1 %1330  ;;  %v765_v19 = vcvt.f32.s32 %v2406_v57 }
 0x18b   : > { %1238 = vmax.xlane.f32.xlu0 %v1237_v37  ;;  %2976 = vst [vmem:[#allocation7_spill] sm:$0xff] %v2548_v9  ;;  %vm1332_vm2 = vcmp.eq.f32.partialorder %v2297_v41, %v2548_v9  ;;  %v2590_v9 = vshll.u32 %v497_v45, 16  ;;  %v609_v45 = vcvt.f32.s32 %v2396_v4  ;;  %v2615_v4 = vshll.u32 %v577_v55, 16 }
 0x18c   : > { %v1333_v3 = vsel %vm1332_vm2, %v1328_v49, -inf  ;;  %v845_v55 = vcvt.f32.s32 %v2418_v8  ;;  %v909_v8 = vcvt.f32.s32 %v2438_v46 }
 0x18e   : > { %v2556_v63 = vpop.xlane.xlu1 %1362  ;;  %v846_v1 = vshll.u32 %v845_v55, 16  ;;  %v893_v55 = vcvt.f32.s32 %v2446_v17 }
 0x18f   : > { %1270 = vmax.xlane.f32.xlu0 %v1269_v29  ;;  %2978 = vst [vmem:[#allocation15_spill] sm:$0xff] %v2556_v63  ;;  %vm1364_vm3 = vcmp.eq.f32.partialorder %v2979_v25, %v2556_v63 }
 0x190   : > { %v1365_v43 = vsel %vm1364_vm3, %v1360_v20, -inf  ;;  %v450_v20 = vshll.u32 %v449_v21, 16  ;;  %v402_v21 = vshll.u32 %v401_v48, 16 }
 0x193   : > { %1302 = vmax.xlane.f32.xlu0 %v1301_v13 }
 0x197   : > { %1334 = vmax.xlane.f32.xlu0 %v1333_v3 }
 0x19b   : > { %1366 = vmax.xlane.f32.xlu0 %v1365_v43 }
 0x1ba   : > { %v367_v29 = vpop.xlane.xlu1 %366 }
 0x1c0   : > { %v383_v37 = vpop.xlane.xlu0 %382 }
 0x1c1   : > { %v384_v28 = vcvt.f32.s32 %v383_v37  ;;  %v433_v37 = vcvt.f32.s32 %v2335_v50 }
 0x1c3   : > { %v2561_v41 = vadd.s32 %v386_v11, %v384_v28  ;;  %v465_v28 = vcvt.f32.s32 %v2346_v35  ;;  %v434_v7 = vshll.u32 %v433_v37, 16  ;;  %v513_v35 = vcvt.f32.s32 %v2366_v39 }
 0x1c4   : > { %v399_v56 = vpop.xlane.xlu0 %398  ;;  %v781_v39 = vcvt.f32.s32 %v2398_v52  ;;  %v219_v52 = vld [vmem:[#allocation2] sm:$0xff] }
 0x1c5   : > { %v2588_v50 = vshll.u32 %v465_v28, 16  ;;  %v2603_v60 = vshll.u32 %v513_v35, 16  ;;  %vm613_vm13 = vcmp.ge.s32.totalorder %v2561_v41, 0 }
 0x1c8   : > { %v415_v38 = vpop.xlane.xlu0 %414 }
 0x1c9   : > { %v416_v13 = vcvt.f32.s32 %v415_v38 }
 0x1ca   : > { %v2564_v27 = vpop.xlane.xlu1 %494 }
 0x1cb   : > { %v2566_v49 = vadd.s32 %v418_v36, %v416_v13  ;;  %v481_v36 = vcvt.f32.s32 %v2356_v47  ;;  %v368_v13 = vcvt.f32.s32 %v367_v29  ;;  %v545_v47 = vcvt.f32.s32 %v2376_v51 }
 0x1cc   : > { %v2568_v58 = vpop.xlane.xlu0 %430  ;;  %v593_v29 = vcvt.f32.s32 %v2378_v22  ;;  %v750_v51 = vshll.u32 %v749_v40, 16  ;;  %v2618_v40 = vshll.u32 %v609_v45, 16  ;;  %v221_v45 = vld [vmem:[#allocation2 + $0x10] sm:$0xff] }
 0x1cd   : > { %v2609_v62 = vshll.u32 %v545_v47, 16  ;;  %v432_v57 = vcvt.f32.s32 %v2568_v58  ;;  %vm615_vm2 = vcmp.ge.s32.totalorder %v2566_v49, 0 }
 0x1ce   : > { %v2571_v3 = vpop.xlane.xlu1 %526 }
 0x1d0   : > { %v447_v25 = vpop.xlane.xlu0 %446 }
 0x1d1   : > { %v448_v43 = vcvt.f32.s32 %v447_v25  ;;  %v370_v25 = vshll.u32 %v369_v59, 16  ;;  %v482_v59 = vshll.u32 %v481_v36, 16 }
 0x1d2   : > { %v2576_v11 = vpop.xlane.xlu1 %558 }
 0x1d3   : > { %v2580_v38 = vadd.s32 %v450_v20, %v448_v43  ;;  %v561_v20 = vcvt.f32.s32 %v2368_v2  ;;  %v400_v43 = vcvt.f32.s32 %v399_v56  ;;  %v371_v37 = vadd.s32 %v370_v25, %v368_v13 }
 0x1d4   : > { %v2582_v10 = vpop.xlane.xlu0 %462  ;;  %v2611_v13 = vshll.u32 %v593_v29, 16  ;;  %v797_v29 = vcvt.f32.s32 %v2416_v26  ;;  %v2980_v26 = vld [vmem:[#allocation3_spill] sm:$0xff] }
 0x1d5   : > { %v2607_v36 = vshll.u32 %v561_v20, 16  ;;  %v403_v25 = vadd.s32 %v402_v21, %v400_v43  ;;  %vm612_vm4 = vcmp.ge.s32.totalorder %v371_v37, 0  ;;  %v813_v20 = vcvt.f32.s32 %v2408_v34 }
 0x1d6   : > { %v2586_v63 = vpop.xlane.xlu1 %590  ;;  %v877_v5 = vcvt.f32.s32 %v2980_v26  ;;  %v973_v26 = vcvt.f32.s32 %v2458_v44  ;;  %v560_v44 = vcvt.f32.s32 %v2576_v11 }
 0x1d7   : > { %vm614_vm7 = vcmp.ge.s32.totalorder %v403_v25, 0 }
 0x1d8   : > { %v479_v48 = vpop.xlane.xlu0 %478 }
 0x1d9   : > { %v480_v28 = vcvt.f32.s32 %v479_v48  ;;  %v782_v48 = vshll.u32 %v781_v39, 16  ;;  %v435_v39 = vadd.s32 %v434_v7, %v432_v57  ;;  %v496_v57 = vcvt.f32.s32 %v2564_v27 }
 0x1da   : > { %v747_v2 = vpop.xlane.xlu1 %746 }
 0x1db   : > { %v2605_v22 = vadd.s32 %v482_v59, %v480_v28  ;;  %v748_v56 = vcvt.f32.s32 %v747_v2  ;;  %v2620_v59 = vshll.u32 %v765_v19, 16  ;;  %v829_v28 = vcvt.f32.s32 %v2426_v54 }
 0x1dc   : > { %v2613_v61 = vpop.xlane.xlu0 %510  ;;  %v646_v2 = vsel %vm612_vm4, %v371_v37, %v219_v52  ;;  %v464_v19 = vcvt.f32.s32 %v2582_v10  ;;  %v2634_v54 = vshll.u32 %v797_v29, 16  ;;  %v648_v10 = vsel %vm614_vm7, %v403_v25, %v221_v45 }
 0x1dd   : > { %v751_v35 = vadd.s32 %v750_v51, %v748_v56  ;;  %v814_v56 = vshll.u32 %v813_v20, 16  ;;  %v2636_v7 = vshll.u32 %v829_v28, 16  ;;  %v223_v20 = vld [vmem:[#allocation2 + $0x20] sm:$0xff]  ;;  %vm616_vm5 = vcmp.ge.s32.totalorder %v435_v39, 0 }
 0x1de   : > { %v779_v47 = vpop.xlane.xlu1 %778  ;;  %v941_v25 = vcvt.f32.s32 %v2448_v31  ;;  %v2657_v31 = vshll.u32 %v893_v55, 16 }
 0x1df   : > { %vm992_vm6 = vcmp.ge.s32.totalorder %v751_v35, 0  ;;  %v1010_v21 = vadd.s32 256, %v751_v35  ;;  %v780_v43 = vcvt.f32.s32 %v779_v47  ;;  %v861_v35 = vcvt.f32.s32 %v2436_v14 }
 0x1e0   : > { %v2626_v58 = vpop.xlane.xlu0 %542  ;;  %v467_v14 = vadd.s32 %v2588_v50, %v464_v19  ;;  %v650_v50 = vsel %vm616_vm5, %v435_v39, %v223_v20  ;;  %v528_v19 = vcvt.f32.s32 %v2571_v3 }
 0x1e1   : > { %v2629_v51 = vsel %vm992_vm6, %v1010_v21, %v646_v2  ;;  %v783_v34 = vadd.s32 %v782_v48, %v780_v43  ;;  %v878_v21 = vshll.u32 %v877_v5, 16  ;;  %v2645_v43 = vshll.u32 %v861_v35, 16  ;;  %v225_v35 = vld [vmem:[#allocation2 + $0x30] sm:$0xff] }
 0x1e2   : > { %v811_v47 = vpop.xlane.xlu1 %810  ;;  %v910_v2 = vshll.u32 %v909_v8, 16  ;;  %v499_v5 = vadd.s32 %v2590_v9, %v496_v57  ;;  %vm618_vm10 = vcmp.ge.s32.totalorder %v467_v14, 0  ;;  %v2664_v9 = vshll.u32 %v973_v26, 16 }
 0x1e3   : > { %vm994_vm8 = vcmp.ge.s32.totalorder %v783_v34, 0  ;;  %v1012_v37 = vadd.s32 256, %v783_v34  ;;  %v812_v52 = vcvt.f32.s32 %v811_v47  ;;  %v925_v34 = vcvt.f32.s32 %v2456_v15 }
 0x1e4   : > { %v2640_v48 = vpop.xlane.xlu0 %574  ;;  %v957_v47 = vcvt.f32.s32 %v2466_v33  ;;  %v1129_v15 = vcvt.f32.s32 %v2468_v18  ;;  %v531_v57 = vadd.s32 %v2598_v16, %v528_v19  ;;  %vm620_vm12 = vcmp.ge.s32.totalorder %v499_v5, 0 }
 0x1e5   : > { %v2643_v46 = vsel %vm994_vm8, %v1012_v37, %v648_v10  ;;  %v815_v29 = vadd.s32 %v814_v56, %v812_v52  ;;  %v942_v37 = vshll.u32 %v941_v25, 16  ;;  %v2662_v10 = vshll.u32 %v925_v34, 16 }
 0x1e6   : > { %v843_v28 = vpop.xlane.xlu1 %842  ;;  %v2669_v11 = vshll.u32 %v957_v47, 16  ;;  %v563_v25 = vadd.s32 %v2607_v36, %v560_v44  ;;  %v1161_v26 = vcvt.f32.s32 %v2479_v32  ;;  %vm622_vm15 = vcmp.ge.s32.totalorder %v531_v57, 0  ;;  %v222_v44 = vld [vmem:[#allocation2 + $0x18] sm:$0xff] }
 0x1e7   : > { %vm996_vm9 = vcmp.ge.s32.totalorder %v815_v29, 0  ;;  %v1014_v27 = vadd.s32 256, %v815_v29  ;;  %v844_v45 = vcvt.f32.s32 %v843_v28  ;;  %v227_v29 = vld [vmem:[#allocation2 + $0x40] sm:$0xff]  ;;  %v2671_v28 = vshll.u32 %v1129_v15, 16 }
 0x1e8   : > { %v2652_v56 = vpop.xlane.xlu0 %606  ;;  %vm624_vm3 = vcmp.ge.s32.totalorder %v563_v25, 0  ;;  %vm617_vm6 = vcmp.ge.s32.totalorder %v2580_v38, 0 }
 0x1e9   : > { %v2655_v17 = vsel %vm996_vm9, %v1014_v27, %v650_v50  ;;  %v847_v8 = vadd.s32 %v846_v1, %v844_v45  ;;  %v652_v1 = vsel %vm618_vm10, %v467_v14, %v225_v35  ;;  %v220_v45 = vld [vmem:[#allocation2 + $0x8] sm:$0xff]  ;;  %v654_v50 = vsel %vm620_vm12, %v499_v5, %v227_v29  ;;  %v229_v35 = vld [vmem:[#allocation2 + $0x50] sm:$0xff]  ;;  %v231_v5 = vld [vmem:[#allocation2 + $0x60] sm:$0xff] }
 0x1ea   : > { %v875_v39 = vpop.xlane.xlu1 %874  ;;  %v647_v15 = vsel %vm613_vm13, %v2561_v41, %v220_v45  ;;  %v649_v29 = vsel %vm615_vm2, %v2566_v49, %v222_v44  ;;  %v658_v45 = vsel %vm624_vm3, %v563_v25, %v231_v5  ;;  %vm619_vm9 = vcmp.ge.s32.totalorder %v2605_v22, 0 }
 0x1eb   : > { %vm998_vm11 = vcmp.ge.s32.totalorder %v847_v8, 0  ;;  %v1016_v3 = vadd.s32 256, %v847_v8  ;;  %v876_v52 = vcvt.f32.s32 %v875_v39  ;;  %v1193_v5 = vcvt.f32.s32 %v2489_v6 }
 0x1ec   : > { %v763_v20 = vpop.xlane.xlu0 %762  ;;  %v576_v6 = vcvt.f32.s32 %v2640_v48 }
 0x1ed   : > { %v2667_v33 = vsel %vm998_vm11, %v1016_v3, %v652_v1  ;;  %v879_v18 = vadd.s32 %v878_v21, %v876_v52  ;;  %v764_v55 = vcvt.f32.s32 %v763_v20  ;;  %v592_v21 = vcvt.f32.s32 %v2586_v63 }
 0x1ee   : > { %v907_v27 = vpop.xlane.xlu1 %906  ;;  %v656_v52 = vsel %vm622_vm15, %v531_v57, %v229_v35  ;;  %v512_v1 = vcvt.f32.s32 %v2613_v61 }
 0x1ef   : > { %vm1000_vm14 = vcmp.ge.s32.totalorder %v879_v18, 0  ;;  %v1018_v16 = vadd.s32 256, %v879_v18  ;;  %v767_v14 = vadd.s32 %v2620_v59, %v764_v55  ;;  %v908_v34 = vcvt.f32.s32 %v907_v27 }
 0x1f0   : > { %v795_v19 = vpop.xlane.xlu0 %794  ;;  %v515_v49 = vadd.s32 %v2603_v60, %v512_v1 }
 0x1f1   : > { %v2678_v8 = vsel %vm1000_vm14, %v1018_v16, %v654_v50  ;;  %vm993_vm1 = vcmp.ge.s32.totalorder %v767_v14, 0  ;;  %v1011_v47 = vadd.s32 256, %v767_v14  ;;  %v911_v36 = vadd.s32 %v910_v2, %v908_v34  ;;  %v224_v14 = vld [vmem:[#allocation2 + $0x28] sm:$0xff]  ;;  %v233_v50 = vld [vmem:[#allocation2 + $0x70] sm:$0xff] }
 0x1f2   : > { %v796_v32 = vcvt.f32.s32 %v795_v19  ;;  %v939_v59 = vpop.xlane.xlu1 %938  ;;  %v595_v2 = vadd.s32 %v2611_v13, %v592_v21  ;;  %v226_v21 = vld [vmem:[#allocation2 + $0x38] sm:$0xff]  ;;  %vm621_vm12 = vcmp.ge.s32.totalorder %v515_v49, 0 }
 0x1f3   : > { %v2684_v39 = vsel %vm993_vm1, %v1011_v47, %v647_v15  ;;  %vm1002_vm4 = vcmp.ge.s32.totalorder %v911_v36, 0  ;;  %v1020_v63 = vadd.s32 256, %v911_v36  ;;  %v940_v3 = vcvt.f32.s32 %v939_v59 }
 0x1f4   : > { %v799_v41 = vadd.s32 %v2634_v54, %v796_v32  ;;  %v827_v20 = vpop.xlane.xlu0 %826  ;;  %vm626_vm5 = vcmp.ge.s32.totalorder %v595_v2, 0  ;;  %v1162_v47 = vshll.u32 %v1161_v26, 16  ;;  %v544_v36 = vcvt.f32.s32 %v2626_v58 }
 0x1f5   : > { %v2691_v18 = vsel %vm1002_vm4, %v1020_v63, %v656_v52  ;;  %v943_v55 = vadd.s32 %v942_v37, %v940_v3  ;;  %v828_v27 = vcvt.f32.s32 %v827_v20  ;;  %v660_v63 = vsel %vm626_vm5, %v595_v2, %v233_v50  ;;  %v228_v3 = vld [vmem:[#allocation2 + $0x48] sm:$0xff]  ;;  %v2981_v50 = vld [vmem:[#allocation9_spill] sm:$0xff] }
 0x1f6   : > { %vm995_vm7 = vcmp.ge.s32.totalorder %v799_v41, 0  ;;  %v1013_v16 = vadd.s32 256, %v799_v41  ;;  %v971_v57 = vpop.xlane.xlu1 %970  ;;  %v547_v41 = vadd.s32 %v2609_v62, %v544_v36 }
 0x1f7   : > { %vm1004_vm8 = vcmp.ge.s32.totalorder %v943_v55, 0  ;;  %v1022_v13 = vadd.s32 256, %v943_v55  ;;  %v831_v61 = vadd.s32 %v2636_v7, %v828_v27  ;;  %v972_v54 = vcvt.f32.s32 %v971_v57 }
 0x1f8   : > { %v2698_v37 = vsel %vm995_vm7, %v1013_v16, %v649_v29  ;;  %v859_v34 = vpop.xlane.xlu0 %858  ;;  %v651_v7 = vsel %vm617_vm6, %v2580_v38, %v224_v14  ;;  %v1194_v55 = vshll.u32 %v1193_v5, 16  ;;  %v1225_v27 = vcvt.f32.s32 %v2499_v23  ;;  %v230_v14 = vld [vmem:[#allocation2 + $0x58] sm:$0xff] }
 0x1f9   : > { %v2700_v25 = vsel %vm1004_vm8, %v1022_v13, %v658_v45  ;;  %vm997_vm10 = vcmp.ge.s32.totalorder %v831_v61, 0  ;;  %v1015_v19 = vadd.s32 256, %v831_v61  ;;  %v975_v35 = vadd.s32 %v2664_v9, %v972_v54 }
 0x1fa   : > { %v860_v15 = vcvt.f32.s32 %v859_v34  ;;  %v1127_v60 = vpop.xlane.xlu1 %1126  ;;  %v653_v9 = vsel %vm619_vm9, %v2605_v22, %v226_v21  ;;  %v655_v45 = vsel %vm621_vm12, %v515_v49, %v228_v3  ;;  %vm623_vm1 = vcmp.ge.s32.totalorder %v547_v41, 0 }
 0x1fb   : > { %v2707_v44 = vsel %vm997_vm10, %v1015_v19, %v651_v7  ;;  %vm1006_vm11 = vcmp.ge.s32.totalorder %v975_v35, 0  ;;  %v1024_v32 = vadd.s32 256, %v975_v35  ;;  %v1128_v59 = vcvt.f32.s32 %v1127_v60 }
 0x1fc   : > { %v863_v26 = vadd.s32 %v2645_v43, %v860_v15  ;;  %v891_v38 = vpop.xlane.xlu0 %890  ;;  %v579_v13 = vadd.s32 %v2615_v4, %v576_v6  ;;  %v608_v61 = vcvt.f32.s32 %v2652_v56  ;;  %v1226_v21 = vshll.u32 %v1225_v27, 16 }
 0x1fd   : > { %v2715_v58 = vsel %vm1006_vm11, %v1024_v32, %v660_v63  ;;  %v1131_v52 = vadd.s32 %v2671_v28, %v1128_v59  ;;  %v892_v1 = vcvt.f32.s32 %v891_v38  ;;  %v1257_v19 = vcvt.f32.s32 %v2509_v30  ;;  %v232_v30 = vld [vmem:[#allocation2 + $0x68] sm:$0xff] }
 0x1fe   : > { %vm999_vm13 = vcmp.ge.s32.totalorder %v863_v26, 0  ;;  %v1017_v2 = vadd.s32 256, %v863_v26  ;;  %v1159_v20 = vpop.xlane.xlu1 %1158  ;;  %vm625_vm3 = vcmp.ge.s32.totalorder %v579_v13, 0  ;;  %v611_v15 = vadd.s32 %v2618_v40, %v608_v61 }
 0x1ff   : > { %vm1372_vm14 = vcmp.ge.s32.totalorder %v1131_v52, 0  ;;  %v1390_v29 = vadd.s32 512, %v1131_v52  ;;  %v895_v22 = vadd.s32 %v2657_v31, %v892_v1  ;;  %v1160_v43 = vcvt.f32.s32 %v1159_v20 }
 0x200   : > { %v2722_v16 = vsel %vm999_vm13, %v1017_v2, %v653_v9  ;;  %v923_v28 = vpop.xlane.xlu0 %922  ;;  %v1145_v40 = vcvt.f32.s32 %v2487_v24  ;;  %v1289_v63 = vcvt.f32.s32 %v2519_v42  ;;  %v659_v6 = vsel %vm625_vm3, %v579_v13, %v232_v30  ;;  %v234_v42 = vld [vmem:[#allocation2 + $0x78] sm:$0xff] }
 0x201   : > { %v1406_v57 = vsel %vm1372_vm14, %v1390_v29, %v2629_v51  ;;  %vm1001_vm15 = vcmp.ge.s32.totalorder %v895_v22, 0  ;;  %v1019_v62 = vadd.s32 256, %v895_v22  ;;  %v1163_v48 = vadd.s32 %v1162_v47, %v1160_v43 }
 0x202   : > { %1423 = vst.msk [vmem:[#allocation2] sm:$0xff] %vm182_vm0, %v1406_v57  ;;  %v924_v31 = vcvt.f32.s32 %v923_v28  ;;  %v1191_v54 = vpop.xlane.xlu1 %1190  ;;  %v989_v51 = vcvt.f32.s32 %v2981_v50  ;;  %v657_v47 = vsel %vm623_vm1, %v547_v41, %v230_v14  ;;  %v1258_v41 = vshll.u32 %v1257_v19, 16 }
 0x203   : > { %v2728_v23 = vsel %vm1001_vm15, %v1019_v62, %v655_v45  ;;  %vm1374_vm2 = vcmp.ge.s32.totalorder %v1163_v48, 0  ;;  %v1392_v49 = vadd.s32 512, %v1163_v48  ;;  %v1192_v34 = vcvt.f32.s32 %v1191_v54 }
 0x204   : > { %v927_v35 = vadd.s32 %v2662_v10, %v924_v31  ;;  %v955_v4 = vpop.xlane.xlu0 %954  ;;  %v990_v5 = vshll.u32 %v989_v51, 16  ;;  %vm627_vm8 = vcmp.ge.s32.totalorder %v611_v15, 0  ;;  %v1146_v29 = vshll.u32 %v1145_v40, 16 }
 0x205   : > { %v1408_v56 = vsel %vm1374_vm2, %v1392_v49, %v2643_v46  ;;  %v1195_v7 = vadd.s32 %v1194_v55, %v1192_v34  ;;  %v956_v36 = vcvt.f32.s32 %v955_v4  ;;  %v1177_v22 = vcvt.f32.s32 %v2497_v0  ;;  %v2982_v4 = vld [vmem:[#allocation4_spill] sm:$0xff] }
 0x206   : > { %1425 = vst.msk [vmem:[#allocation2 + $0x10] sm:$0xff] %vm182_vm0, %v1408_v56  ;;  %vm1003_vm4 = vcmp.ge.s32.totalorder %v927_v35, 0  ;;  %v1021_v60 = vadd.s32 256, %v927_v35  ;;  %v1223_v32 = vpop.xlane.xlu1 %1222  ;;  %v1290_v27 = vshll.u32 %v1289_v63, 16  ;;  %v1321_v48 = vcvt.f32.s32 %v2529_v12 }
 0x207   : > { %vm1376_vm6 = vcmp.ge.s32.totalorder %v1195_v7, 0  ;;  %v1394_v10 = vadd.s32 512, %v1195_v7  ;;  %v959_v46 = vadd.s32 %v2669_v11, %v956_v36  ;;  %v1224_v59 = vcvt.f32.s32 %v1223_v32 }
 0x208   : > { %v2746_v9 = vsel %vm1003_vm4, %v1021_v60, %v657_v47  ;;  %v987_v26 = vpop.xlane.xlu0 %986  ;;  %v661_v14 = vsel %vm627_vm8, %v611_v15, %v234_v42  ;;  %v1178_v19 = vshll.u32 %v1177_v22, 16  ;;  %v1322_v35 = vshll.u32 %v1321_v48, 16 }
 0x209   : > { %v1442_v38 = vld [vmem:[#allocation2] sm:$0xff]  ;;  %v1410_v3 = vsel %vm1376_vm6, %v1394_v10, %v2655_v17  ;;  %vm1005_vm7 = vcmp.ge.s32.totalorder %v959_v46, 0  ;;  %v1023_v52 = vadd.s32 256, %v959_v46  ;;  %v1227_v1 = vadd.s32 %v1226_v21, %v1224_v59 }
 0x20a   : > { %1458 = vst.msk [vmem:[%s2741_s26] sm:$0xff] %vm182_vm0, %v1442_v38  ;;  %1427 = vst.msk [vmem:[#allocation2 + $0x20] sm:$0xff] %vm182_vm0, %v1410_v3  ;;  %v988_v24 = vcvt.f32.s32 %v987_v26  ;;  %v1255_v11 = vpop.xlane.xlu1 %1254  ;;  %v1353_v47 = vcvt.f32.s32 %v2982_v4 }
 0x20b   : > { %v2753_v2 = vsel %vm1005_vm7, %v1023_v52, %v659_v6  ;;  %vm1378_vm5 = vcmp.ge.s32.totalorder %v1227_v1, 0  ;;  %v1396_v20 = vadd.s32 512, %v1227_v1  ;;  %v1256_v17 = vcvt.f32.s32 %v1255_v11  ;;  %v2984_v1 = vld [vmem:[#allocation11_spill] sm:$0xff] }
 0x20c   : > { %v991_v43 = vadd.s32 %v990_v5, %v988_v24  ;;  %v1143_v55 = vpop.xlane.xlu0 %1142  ;;  %v2983_v5 = vld [vmem:[#allocation5_spill] sm:$0xff]  ;;  %v1354_v63 = vshll.u32 %v1353_v47, 16 }
 0x20d   : > { %v1444_v45 = vld [vmem:[#allocation2 + $0x10] sm:$0xff]  ;;  %v1412_v28 = vsel %vm1378_vm5, %v1396_v20, %v2667_v33  ;;  %v1259_v57 = vadd.s32 %v1258_v41, %v1256_v17  ;;  %v1144_v62 = vcvt.f32.s32 %v1143_v55  ;;  %v1209_v33 = vcvt.f32.s32 %v2507_v53 }
 0x20e   : > { %1460 = vst.msk [vmem:[%s2741_s26 + $0x10] sm:$0xff] %vm182_vm0, %v1444_v45  ;;  %1429 = vst.msk [vmem:[#allocation2 + $0x30] sm:$0xff] %vm182_vm0, %v1412_v28  ;;  %vm1007_vm9 = vcmp.ge.s32.totalorder %v991_v43, 0  ;;  %v1025_v13 = vadd.s32 256, %v991_v43  ;;  %v1287_v61 = vpop.xlane.xlu1 %1286  ;;  %v1241_v40 = vcvt.f32.s32 %v2983_v5  ;;  %v1273_v41 = vcvt.f32.s32 %v2984_v1  ;;  %v2985_v45 = vld [vmem:[#allocation14_spill] sm:$0xff] }
 0x20f   : > { %vm1380_vm10 = vcmp.ge.s32.totalorder %v1259_v57, 0  ;;  %v1398_v0 = vadd.s32 512, %v1259_v57  ;;  %v1147_v31 = vadd.s32 %v1146_v29, %v1144_v62  ;;  %v1288_v54 = vcvt.f32.s32 %v1287_v61 }
 0x210   : > { %v2763_v49 = vsel %vm1007_vm9, %v1025_v13, %v661_v14  ;;  %v1175_v34 = vpop.xlane.xlu0 %1174  ;;  %v1210_v32 = vshll.u32 %v1209_v33, 16  ;;  %v1242_v17 = vshll.u32 %v1241_v40, 16  ;;  %v1305_v28 = vcvt.f32.s32 %v2985_v45  ;;  %v2986_v13 = vld [vmem:[#allocation7_spill] sm:$0xff] }
 0x211   : > { %v1446_v12 = vld [vmem:[#allocation2 + $0x20] sm:$0xff]  ;;  %v1414_v50 = vsel %vm1380_vm10, %v1398_v0, %v2678_v8  ;;  %vm1373_vm11 = vcmp.ge.s32.totalorder %v1147_v31, 0  ;;  %v1391_v51 = vadd.s32 512, %v1147_v31  ;;  %v1291_v21 = vadd.s32 %v1290_v27, %v1288_v54 }
 0x212   : > { %1462 = vst.msk [vmem:[%s2741_s26 + $0x20] sm:$0xff] %vm182_vm0, %v1446_v12  ;;  %1431 = vst.msk [vmem:[#allocation2 + $0x40] sm:$0xff] %vm182_vm0, %v1414_v50  ;;  %v1176_v56 = vcvt.f32.s32 %v1175_v34  ;;  %v1319_v53 = vpop.xlane.xlu1 %1318  ;;  %v1274_v27 = vshll.u32 %v1273_v41, 16  ;;  %v1337_v61 = vcvt.f32.s32 %v2986_v13  ;;  %v1306_v33 = vshll.u32 %v1305_v28, 16 }
 0x213   : > { %v1407_v7 = vsel %vm1373_vm11, %v1391_v51, %v2684_v39  ;;  %vm1382_vm12 = vcmp.ge.s32.totalorder %v1291_v21, 0  ;;  %v1400_v36 = vadd.s32 512, %v1291_v21  ;;  %v1320_v15 = vcvt.f32.s32 %v1319_v53 }
 0x214   : > { %1424 = vst.msk [vmem:[#allocation2 + $0x8] sm:$0xff] %vm182_vm0, %v1407_v7  ;;  %v1179_v8 = vadd.s32 %v1178_v19, %v1176_v56  ;;  %v1207_v60 = vpop.xlane.xlu0 %1206  ;;  %v1338_v19 = vshll.u32 %v1337_v61, 16 }
 0x215   : > { %v1448_v30 = vld [vmem:[#allocation2 + $0x30] sm:$0xff]  ;;  %v1416_v10 = vsel %vm1382_vm12, %v1400_v36, %v2691_v18  ;;  %v1323_v46 = vadd.s32 %v1322_v35, %v1320_v15  ;;  %v1208_v59 = vcvt.f32.s32 %v1207_v60  ;;  %v2987_v35 = vld [vmem:[#allocation15_spill] sm:$0xff] }
 0x216   : > { %1464 = vst.msk [vmem:[%s2741_s26 + $0x30] sm:$0xff] %vm182_vm0, %v1448_v30  ;;  %1433 = vst.msk [vmem:[#allocation2 + $0x50] sm:$0xff] %vm182_vm0, %v1416_v10  ;;  %vm1375_vm13 = vcmp.ge.s32.totalorder %v1179_v8, 0  ;;  %v1393_v39 = vadd.s32 512, %v1179_v8  ;;  %v1351_v26 = vpop.xlane.xlu1 %1350  ;;  %v1369_v4 = vcvt.f32.s32 %v2987_v35 }
 0x217   : > { %vm1384_vm14 = vcmp.ge.s32.totalorder %v1323_v46, 0  ;;  %v1402_v38 = vadd.s32 512, %v1323_v46  ;;  %v1211_v3 = vadd.s32 %v1210_v32, %v1208_v59  ;;  %v1352_v52 = vcvt.f32.s32 %v1351_v26 }
 0x218   : > { %v1409_v18 = vsel %vm1375_vm13, %v1393_v39, %v2698_v37  ;;  %v1239_v6 = vpop.xlane.xlu0 %1238  ;;  %v1370_v8 = vshll.u32 %v1369_v4, 16 }
 0x219   : > { %v1450_v24 = vld [vmem:[#allocation2 + $0x40] sm:$0xff]  ;;  %1426 = vst.msk [vmem:[#allocation2 + $0x18] sm:$0xff] %vm182_vm0, %v1409_v18  ;;  %v1418_v11 = vsel %vm1384_vm14, %v1402_v38, %v2700_v25  ;;  %vm1377_vm15 = vcmp.ge.s32.totalorder %v1211_v3, 0  ;;  %v1395_v42 = vadd.s32 512, %v1211_v3  ;;  %v1355_v20 = vadd.s32 %v1354_v63, %v1352_v52 }
 0x21a   : > { %1466 = vst.msk [vmem:[%s2741_s26 + $0x40] sm:$0xff] %vm182_vm0, %v1450_v24  ;;  %1435 = vst.msk [vmem:[#allocation2 + $0x60] sm:$0xff] %vm182_vm0, %v1418_v11  ;;  %v1240_v29 = vcvt.f32.s32 %v1239_v6 }
 0x21b   : > { %v1443_v22 = vld [vmem:[#allocation2 + $0x8] sm:$0xff]  ;;  %v1411_v37 = vsel %vm1377_vm15, %v1395_v42, %v2707_v44  ;;  %vm1386_vm1 = vcmp.ge.s32.totalorder %v1355_v20, 0  ;;  %v1404_v43 = vadd.s32 512, %v1355_v20 }
 0x21c   : > { %1459 = vst.msk [vmem:[%s2741_s26 + $0x8] sm:$0xff] %vm182_vm0, %v1443_v22  ;;  %1428 = vst.msk [vmem:[#allocation2 + $0x28] sm:$0xff] %vm182_vm0, %v1411_v37  ;;  %v1243_v25 = vadd.s32 %v1242_v17, %v1240_v29  ;;  %v1271_v55 = vpop.xlane.xlu0 %1270 }
 0x21d   : > { %v1452_v57 = vld [vmem:[#allocation2 + $0x50] sm:$0xff]  ;;  %v1420_v62 = vsel %vm1386_vm1, %v1404_v43, %v2715_v58  ;;  %v1272_v48 = vcvt.f32.s32 %v1271_v55 }
 0x21e   : > { %1468 = vst.msk [vmem:[%s2741_s26 + $0x50] sm:$0xff] %vm182_vm0, %v1452_v57  ;;  %1437 = vst.msk [vmem:[#allocation2 + $0x70] sm:$0xff] %vm182_vm0, %v1420_v62  ;;  %vm1379_vm2 = vcmp.ge.s32.totalorder %v1243_v25, 0  ;;  %v1397_v44 = vadd.s32 512, %v1243_v25 }
 0x21f   : > { %v1275_v14 = vadd.s32 %v1274_v27, %v1272_v48 }
 0x220   : > { %v1445_v0 = vld [vmem:[#allocation2 + $0x18] sm:$0xff]  ;;  %v1413_v31 = vsel %vm1379_vm2, %v1397_v44, %v2722_v16  ;;  %v1303_v54 = vpop.xlane.xlu0 %1302 }
 0x221   : > { %1461 = vst.msk [vmem:[%s2741_s26 + $0x18] sm:$0xff] %vm182_vm0, %v1445_v0  ;;  %v1454_v58 = vld [vmem:[#allocation2 + $0x60] sm:$0xff]  ;;  %1430 = vst.msk [vmem:[#allocation2 + $0x38] sm:$0xff] %vm182_vm0, %v1413_v31  ;;  %vm1381_vm3 = vcmp.ge.s32.totalorder %v1275_v14, 0  ;;  %v1399_v34 = vadd.s32 512, %v1275_v14  ;;  %v1304_v12 = vcvt.f32.s32 %v1303_v54 }
 0x222   : > { %1470 = vst.msk [vmem:[%s2741_s26 + $0x60] sm:$0xff] %vm182_vm0, %v1454_v58 }
 0x223   : > { %v1447_v50 = vld [vmem:[#allocation2 + $0x28] sm:$0xff]  ;;  %v1415_v51 = vsel %vm1381_vm3, %v1399_v34, %v2728_v23  ;;  %v1307_v21 = vadd.s32 %v1306_v33, %v1304_v12 }
 0x224   : > { %1463 = vst.msk [vmem:[%s2741_s26 + $0x28] sm:$0xff] %vm182_vm0, %v1447_v50  ;;  %1432 = vst.msk [vmem:[#allocation2 + $0x48] sm:$0xff] %vm182_vm0, %v1415_v51  ;;  %v1335_v16 = vpop.xlane.xlu0 %1334 }
 0x225   : > { %v1456_v47 = vld [vmem:[#allocation2 + $0x70] sm:$0xff]  ;;  %vm1383_vm4 = vcmp.ge.s32.totalorder %v1307_v21, 0  ;;  %v1401_v56 = vadd.s32 512, %v1307_v21  ;;  %v1336_v53 = vcvt.f32.s32 %v1335_v16 }
 0x226   : > { %1472 = vst.msk [vmem:[%s2741_s26 + $0x70] sm:$0xff] %vm182_vm0, %v1456_v47 }
 0x227   : > { %v1417_v7 = vsel %vm1383_vm4, %v1401_v56, %v2746_v9  ;;  %v1339_v23 = vadd.s32 %v1338_v19, %v1336_v53 }
 0x228   : > { %v1449_v36 = vld [vmem:[#allocation2 + $0x38] sm:$0xff]  ;;  %1434 = vst.msk [vmem:[#allocation2 + $0x58] sm:$0xff] %vm182_vm0, %v1417_v7  ;;  %v1367_v15 = vpop.xlane.xlu0 %1366 }
 0x229   : > { %1465 = vst.msk [vmem:[%s2741_s26 + $0x38] sm:$0xff] %vm182_vm0, %v1449_v36  ;;  %vm1385_vm6 = vcmp.ge.s32.totalorder %v1339_v23, 0  ;;  %v1403_v60 = vadd.s32 512, %v1339_v23  ;;  %v1368_v32 = vcvt.f32.s32 %v1367_v15 }
 0x22b   : > { %v1451_v30 = vld [vmem:[#allocation2 + $0x48] sm:$0xff]  ;;  %v1419_v10 = vsel %vm1385_vm6, %v1403_v60, %v2753_v2  ;;  %v1371_v46 = vadd.s32 %v1370_v8, %v1368_v32 }
 0x22c   : > { %1467 = vst.msk [vmem:[%s2741_s26 + $0x48] sm:$0xff] %vm182_vm0, %v1451_v30  ;;  %1436 = vst.msk [vmem:[#allocation2 + $0x68] sm:$0xff] %vm182_vm0, %v1419_v10 }
 0x22d   : > { %vm1387_vm7 = vcmp.ge.s32.totalorder %v1371_v46, 0  ;;  %v1405_v9 = vadd.s32 512, %v1371_v46 }
 0x22f   : > { %v1453_v59 = vld [vmem:[#allocation2 + $0x58] sm:$0xff]  ;;  %v1421_v5 = vsel %vm1387_vm7, %v1405_v9, %v2763_v49 }
 0x230   : > { %1469 = vst.msk [vmem:[%s2741_s26 + $0x58] sm:$0xff] %vm182_vm0, %v1453_v59  ;;  %1438 = vst.msk [vmem:[#allocation2 + $0x78] sm:$0xff] %vm182_vm0, %v1421_v5 }
 0x233   : > { %v1455_v40 = vld [vmem:[#allocation2 + $0x68] sm:$0xff] }
 0x234   : > { %1471 = vst.msk [vmem:[%s2741_s26 + $0x68] sm:$0xff] %vm182_vm0, %v1455_v40 }
 0x237   : > { %v1457_v63 = vld [vmem:[#allocation2 + $0x78] sm:$0xff] }
 0x238   : > { %1473 = vst.msk [vmem:[%s2741_s26 + $0x78] sm:$0xff] %vm182_vm0, %v1457_v63 }
 0x239 PF: > { %s12_s11 = sadd.s32 1, %s1615_s11   ;;  %s2988_s9 = smov %s1611_s10 }
 0x23a   : > { %p9_p5 = scmp.ge.s32.totalorder %s12_s11, 4   ;;  %s2989_s10 = smov %s2991_s12 }
 0x23c   :  { %11 = sbr.rel (!%p9_p5) target bundleno = 2 (0x2), region = 71 }

</bundles_post_ra>
